<compile_context>
chip_gen: v7x
topology: tpu7x:2x2x1
jax: 0.10.0
libtpu: 0.0.40
codegen_flags: <defaults>
</compile_context>

<pallas_src>
import functools

import jax
import jax.numpy as jnp
from jax import lax
from jax.experimental import pallas as pl
from jax.experimental.pallas import tpu as pltpu

EPS = 1e-5                       # nn.LayerNorm default
_INV_SQRT2 = 0.7071067811865476  # for exact (erf) GELU


# ----------------------------- in-kernel helpers -----------------------------

def _layernorm(x, gamma, beta):
    """f32 LayerNorm over the last axis; gamma/beta broadcast over rows."""
    mean = jnp.mean(x, axis=-1, keepdims=True)
    var = jnp.mean((x - mean) ** 2, axis=-1, keepdims=True)
    return (x - mean) * lax.rsqrt(var + EPS) * gamma + beta


# ------------------------------- fused kernel -------------------------------

def _transformer_kernel(heads, dim_head,
                        x_ref,
                        ag_ref, ab_ref, wqkv_ref, wo_ref,
                        fg_ref, fb_ref, w1_ref, b1_ref, w2_ref, b2_ref,
                        og_ref, ob_ref,
                        o_ref,
                        x_scr):
    l = pl.program_id(1)                 # depth index (innermost, "arbitrary")
    Bt, N, D = x_ref.shape
    rows = Bt * N
    inner = heads * dim_head
    f32, bf16 = jnp.float32, jnp.bfloat16

    # ---- residual init: load this batch tile into the persistent scratch ----
    @pl.when(l == 0)
    def _():
        x_scr[...] = x_ref[...]

    x = x_scr[...].reshape(rows, D)      # f32 residual, batch folded into rows

    # ------------------------ attention block (pre-norm) ------------------------
    xn = _layernorm(x, ag_ref[0], ab_ref[0]).astype(bf16)            # (rows, D)
    # Single fused QKV matmul (scale already folded into the Q weight columns).
    qkv = jnp.dot(xn, wqkv_ref[0], preferred_element_type=f32)       # (rows, 3*inner)

    def heads_to_batch(col0):
        # Gather one head's columns (head-major packing) and fold (head, batch)
        # into a single batched-attention axis.  Reshapes only split/merge
        # leading dims; the stack is along a new leading axis.
        parts = [qkv[:, col0 + h * dim_head: col0 + (h + 1) * dim_head]
                 .reshape(Bt, N, dim_head) for h in range(heads)]
        return jnp.stack(parts, axis=0).reshape(heads * Bt, N, dim_head).astype(bf16)

    qg = heads_to_batch(0)
    kg = heads_to_batch(inner)
    vg = heads_to_batch(2 * inner)

    dots = jnp.einsum('gnd,gmd->gnm', qg, kg,
                      preferred_element_type=f32)                    # (G, N, N) f32
    dots = dots - jnp.max(dots, axis=-1, keepdims=True)
    e = jnp.exp(dots)
    # approx reciprocal runs on the EUP slot instead of the VALU divide
    attn = e * pl.reciprocal(jnp.sum(e, axis=-1, keepdims=True), approx=True)

    out = jnp.einsum('gnm,gmd->gnd', attn.astype(bf16), vg,
                     preferred_element_type=f32)                     # (G, N, dh)
    out = out.reshape(heads, rows, dim_head)                         # leading merge
    # Merge heads back to torch's (h d) column order, then ONE output projection.
    merged = jnp.concatenate([out[h] for h in range(heads)], axis=-1)  # (rows, inner)
    x = jnp.dot(merged.astype(bf16), wo_ref[0],
                preferred_element_type=f32) + x                      # residual

    # ----------------------- feedforward block (pre-norm) -----------------------
    hn = _layernorm(x, fg_ref[0], fb_ref[0]).astype(bf16)            # (rows, D)
    h = jnp.dot(hn, w1_ref[0], preferred_element_type=f32) + b1_ref[0]
    h = 0.5 * h * (1.0 + lax.erf(h * _INV_SQRT2))                    # exact GELU, f32
    y = jnp.dot(h.astype(bf16), w2_ref[0],
                preferred_element_type=f32) + b2_ref[0]
    x = y + x                                                        # residual

    x_scr[...] = x.reshape(Bt, N, D)     # carry residual to the next layer

    # ---- final LayerNorm + store on the last depth iteration ----
    @pl.when(l == pl.num_programs(1) - 1)
    def _():
        o_ref[...] = _layernorm(x, og_ref[...], ob_ref[...]).reshape(Bt, N, D)


# ------------------------------- wrapper -------------------------------

def _vmem_limit_bytes():
    cap = 64 * 1024 * 1024
    try:
        info = pltpu.get_tpu_info()
        cap = int(getattr(info, "vmem_capacity_bytes", cap))
    except Exception:
        pass
    # leave headroom for Mosaic internals: ~96 MiB on v5e/v6e, ~48 MiB on v7x
    return int(min(cap * 3 // 4, 100 * 1024 * 1024))


def transformer_pallas(x, kp, heads, dim_head, block_b=None):
    B, N, D = x.shape
    depth = kp["wqkv"].shape[0]
    mlp = kp["w1"].shape[-1]
    inner = heads * dim_head

    # Batch tile ("parallel" axis).  A tile must span whole sequences, so we
    # tile over batch only; target >=256 rows per tile when batch allows it.
    if block_b is None:
        block_b = max(1, min(B, max(1, 256 // N)))
    while B % block_b:
        block_b -= 1
    n_btiles = B // block_b

    def dspec(rc):  # one layer's slice of a (depth, R, C) weight array
        return pl.BlockSpec((1,) + rc, lambda b, l: (l, 0, 0))

    in_specs = [
        pl.BlockSpec((block_b, N, D), lambda b, l: (b, 0, 0)),   # x
        dspec((1, D)), dspec((1, D)),                            # attn LN g/b
        dspec((D, 3 * inner)),                                   # fused Wqkv (bf16)
        dspec((inner, D)),                                       # Wo (bf16)
        dspec((1, D)), dspec((1, D)),                            # ff LN g/b
        dspec((D, mlp)), dspec((1, mlp)),                        # W1 (bf16), b1
        dspec((mlp, D)), dspec((1, D)),                          # W2 (bf16), b2
        pl.BlockSpec((1, D), lambda b, l: (0, 0)),               # final LN g
        pl.BlockSpec((1, D), lambda b, l: (0, 0)),               # final LN b
    ]
    out_specs = pl.BlockSpec((block_b, N, D), lambda b, l: (b, 0, 0))

    grid_spec = pltpu.PrefetchScalarGridSpec(
        num_scalar_prefetch=0,
        grid=(n_btiles, depth),
        in_specs=in_specs,
        out_specs=out_specs,
        scratch_shapes=[pltpu.VMEM((block_b, N, D), jnp.float32)],  # residual
    )

    kernel = functools.partial(_transformer_kernel, heads, dim_head)

    return pl.pallas_call(
        kernel,
        out_shape=jax.ShapeDtypeStruct((B, N, D), x.dtype),
        grid_spec=grid_spec,
        compiler_params=pltpu.CompilerParams(
            dimension_semantics=("parallel", "arbitrary"),
            vmem_limit_bytes=_vmem_limit_bytes(),
        ),
    )(x,
      kp["a_g"], kp["a_b"], kp["wqkv"], kp["wo"],
      kp["f_g"], kp["f_b"], kp["w1"], kp["b1"], kp["w2"], kp["b2"],
      kp["o_g"], kp["o_b"])


# ------------------------------- params -------------------------------

def init_params(key, dim, depth, heads, dim_head, mlp_dim):
    """Torch-layout-equivalent f32 parameters (also used by the reference)."""
    inner = heads * dim_head
    layers = []
    for _ in range(depth):
        key, *ks = jax.random.split(key, 11)
        attn = {
            "ln_g": 1.0 + 0.01 * jax.random.normal(ks[0], (1, dim), jnp.float32),
            "ln_b": 0.01 * jax.random.normal(ks[1], (1, dim), jnp.float32),
            "w_qkv": 0.05 * jax.random.normal(ks[2], (dim, 3 * inner), jnp.float32),
            "w_out": 0.05 * jax.random.normal(ks[3], (inner, dim), jnp.float32),
        }
        ff = {
            "ln_g": 1.0 + 0.01 * jax.random.normal(ks[4], (1, dim), jnp.float32),
            "ln_b": 0.01 * jax.random.normal(ks[5], (1, dim), jnp.float32),
            "w1": 0.05 * jax.random.normal(ks[6], (dim, mlp_dim), jnp.float32),
            "b1": 0.01 * jax.random.normal(ks[7], (1, mlp_dim), jnp.float32),
            "w2": 0.05 * jax.random.normal(ks[8], (mlp_dim, dim), jnp.float32),
            "b2": 0.01 * jax.random.normal(ks[9], (1, dim), jnp.float32),
        }
        layers.append((attn, ff))
    key, k1, k2 = jax.random.split(key, 3)
    final_p = {
        "ln_g": 1.0 + 0.01 * jax.random.normal(k1, (1, dim), jnp.float32),
        "ln_b": 0.01 * jax.random.normal(k2, (1, dim), jnp.float32),
    }
    return layers, final_p


def pack_kernel_params(layers, final_p, heads, dim_head):
    """Stack per-layer params along a depth axis (so the kernel can stream them
    per layer), fold the attention scale into the Q weight columns, and pre-cast
    matmul weights to bf16 for the MXU."""
    depth = len(layers)
    scale = dim_head ** (-0.5)

    a_g = jnp.stack([ap["ln_g"] for ap, _ in layers])                 # (depth, 1, D)
    a_b = jnp.stack([ap["ln_b"] for ap, _ in layers])
    w_qkv = jnp.stack([ap["w_qkv"] for ap, _ in layers])              # (depth, D, 3*inner)
    wq, wk, wv = jnp.split(w_qkv, 3, axis=-1)
    wqkv = jnp.concatenate([wq * scale, wk, wv], axis=-1).astype(jnp.bfloat16)
    wo = jnp.stack([ap["w_out"] for ap, _ in layers]).astype(jnp.bfloat16)  # (depth, inner, D)

    f_g = jnp.stack([fp["ln_g"] for _, fp in layers])                 # (depth, 1, D)
    f_b = jnp.stack([fp["ln_b"] for _, fp in layers])
    w1 = jnp.stack([fp["w1"] for _, fp in layers]).astype(jnp.bfloat16)     # (depth, D, mlp)
    b1 = jnp.stack([fp["b1"] for _, fp in layers])                    # (depth, 1, mlp) f32
    w2 = jnp.stack([fp["w2"] for _, fp in layers]).astype(jnp.bfloat16)     # (depth, mlp, D)
    b2 = jnp.stack([fp["b2"] for _, fp in layers])                    # (depth, 1, D) f32

    return dict(a_g=a_g, a_b=a_b, wqkv=wqkv, wo=wo,
                f_g=f_g, f_b=f_b, w1=w1, b1=b1, w2=w2, b2=b2,
                o_g=final_p["ln_g"], o_b=final_p["ln_b"])


# ------------------------------- reference -------------------------------

def _ln_ref(x, g, b):
    m = jnp.mean(x, axis=-1, keepdims=True)
    v = jnp.mean((x - m) ** 2, axis=-1, keepdims=True)
    return (x - m) * lax.rsqrt(v + EPS) * g + b


def transformer_ref(x, layers, final_p, heads, dim_head):
    inner = heads * dim_head
    B, N, _ = x.shape
    hp = jax.lax.Precision.HIGHEST
    for ap, fp in layers:
        xn = _ln_ref(x, ap["ln_g"][0], ap["ln_b"][0])
        qkv = jnp.dot(xn, ap["w_qkv"], precision=hp)
        q, k, v = jnp.split(qkv, 3, axis=-1)
        rh = lambda t: t.reshape(B, N, heads, dim_head).transpose(0, 2, 1, 3)
        q, k, v = rh(q), rh(k), rh(v)
        dots = jnp.einsum("bhnd,bhmd->bhnm", q, k, precision=hp) * dim_head ** (-0.5)
        attn = jax.nn.softmax(dots, axis=-1)
        o = jnp.einsum("bhnm,bhmd->bhnd", attn, v, precision=hp)
        o = o.transpose(0, 2, 1, 3).reshape(B, N, inner)
        x = jnp.dot(o, ap["w_out"], precision=hp) + x
        hn = _ln_ref(x, fp["ln_g"][0], fp["ln_b"][0])
        h = jnp.dot(hn, fp["w1"], precision=hp) + fp["b1"][0]
        h = jax.nn.gelu(h, approximate=False)
        x = jnp.dot(h, fp["w2"], precision=hp) + fp["b2"][0] + x
    return _ln_ref(x, final_p["ln_g"][0], final_p["ln_b"][0])


# ------------------------------------ main ------------------------------------

if __name__ == "__main__":
    # Small Transformer: dim=32, depth=2, heads=4, dim_head=8, mlp_dim=64
    B, N, DIM = 2, 8, 32
    DEPTH, HEADS, DIM_HEAD, MLP_DIM = 2, 4, 8, 64

    root = jax.random.PRNGKey(0)
    kx, kp = jax.random.split(root)
    x = jax.random.normal(kx, (B, N, DIM), jnp.float32)
    layers, final_p = init_params(kp, DIM, DEPTH, HEADS, DIM_HEAD, MLP_DIM)
    kparams = pack_kernel_params(layers, final_p, HEADS, DIM_HEAD)

    y = transformer_pallas(x, kparams, HEADS, DIM_HEAD)
    y = jax.block_until_ready(y)

    # f32 reference; tolerance loosened slightly for bf16 MXU inputs in the kernel.
    y_ref = transformer_ref(x, layers, final_p, HEADS, DIM_HEAD)
    if not jnp.allclose(y, y_ref, atol=2e-2, rtol=2e-2):
        err = float(jnp.max(jnp.abs(y - y_ref)))
        raise AssertionError(
            f"Pallas transformer output mismatch vs JAX reference (max abs err {err})")

    print("KERNEL_OK")
</pallas_src>

<mosaic_0001>
module attributes {stable_mosaic.version = 11 : i64} {
  func.func @_transformer_kernel(%arg0: i32, %arg1: i32, %arg2: memref<2x8x32xf32, #tpu.memory_space<vmem>>, %arg3: memref<1x1x32xf32, #tpu.memory_space<vmem>>, %arg4: memref<1x1x32xf32, #tpu.memory_space<vmem>>, %arg5: memref<1x32x96xbf16, #tpu.memory_space<vmem>>, %arg6: memref<1x32x32xbf16, #tpu.memory_space<vmem>>, %arg7: memref<1x1x32xf32, #tpu.memory_space<vmem>>, %arg8: memref<1x1x32xf32, #tpu.memory_space<vmem>>, %arg9: memref<1x32x64xbf16, #tpu.memory_space<vmem>>, %arg10: memref<1x1x64xf32, #tpu.memory_space<vmem>>, %arg11: memref<1x64x32xbf16, #tpu.memory_space<vmem>>, %arg12: memref<1x1x32xf32, #tpu.memory_space<vmem>>, %arg13: memref<1x32xf32, #tpu.memory_space<vmem>>, %arg14: memref<1x32xf32, #tpu.memory_space<vmem>>, %arg15: memref<2x8x32xf32, #tpu.memory_space<vmem>>, %arg16: memref<2x8x32xf32, #tpu.memory_space<vmem>>) attributes {dimension_semantics = [#tpu.dimension_semantics<parallel>, #tpu.dimension_semantics<arbitrary>], iteration_bounds = array<i64: 1, 2>, scalar_prefetch = 0 : i64, scratch_operands = 1 : i64, tpu.core_type = #tpu.core_type<tc>, window_params = [{transform_indices = @transform_0, window_bounds = array<i64: 2, 8, 32>}, {transform_indices = @transform_1, window_bounds = array<i64: 1, 1, 32>}, {transform_indices = @transform_2, window_bounds = array<i64: 1, 1, 32>}, {transform_indices = @transform_3, window_bounds = array<i64: 1, 32, 96>}, {transform_indices = @transform_4, window_bounds = array<i64: 1, 32, 32>}, {transform_indices = @transform_5, window_bounds = array<i64: 1, 1, 32>}, {transform_indices = @transform_6, window_bounds = array<i64: 1, 1, 32>}, {transform_indices = @transform_7, window_bounds = array<i64: 1, 32, 64>}, {transform_indices = @transform_8, window_bounds = array<i64: 1, 1, 64>}, {transform_indices = @transform_9, window_bounds = array<i64: 1, 64, 32>}, {transform_indices = @transform_10, window_bounds = array<i64: 1, 1, 32>}, {pipeline_mode = #tpu.pipeline_mode<synchronous>, transform_indices = @transform_11, window_bounds = array<i64: 1, 32>}, {pipeline_mode = #tpu.pipeline_mode<synchronous>, transform_indices = @transform_12, window_bounds = array<i64: 1, 32>}, {transform_indices = @transform_13, window_bounds = array<i64: 2, 8, 32>}]} {
    %c0_i32 = arith.constant 0 : i32
    %0 = arith.cmpi eq, %arg1, %c0_i32 : i32
    %1 = arith.extui %0 : i1 to i32
    %c0_i32_0 = arith.constant 0 : i32
    %2 = arith.cmpi ne, %1, %c0_i32_0 : i32
    scf.if %2 {
      %c0_57 = arith.constant 0 : index
      %c0_58 = arith.constant 0 : index
      %c0_59 = arith.constant 0 : index
      %164 = vector.load %arg2[%c0_57, %c0_58, %c0_59] : memref<2x8x32xf32, #tpu.memory_space<vmem>>, vector<2x8x32xf32>
      %c0_60 = arith.constant 0 : index
      %c0_61 = arith.constant 0 : index
      %c0_62 = arith.constant 0 : index
      %165 = vector.load %arg16[%c0_60, %c0_61, %c0_62] : memref<2x8x32xf32, #tpu.memory_space<vmem>>, vector<2x8x32xf32>
      tpu.vector_store %arg16[%c0_60, %c0_61, %c0_62], %164 {strides = array<i32>} : memref<2x8x32xf32, #tpu.memory_space<vmem>>, vector<2x8x32xf32>,
    } else {
    }
    %c0 = arith.constant 0 : index
    %c0_1 = arith.constant 0 : index
    %c0_2 = arith.constant 0 : index
    %3 = vector.load %arg16[%c0, %c0_1, %c0_2] : memref<2x8x32xf32, #tpu.memory_space<vmem>>, vector<2x8x32xf32>
    %4 = vector.shape_cast %3 : vector<2x8x32xf32> to vector<16x32xf32>
    %c0_3 = arith.constant 0 : index
    %c0_4 = arith.constant 0 : index
    %c0_5 = arith.constant 0 : index
    %5 = vector.load %arg3[%c0_3, %c0_4, %c0_5] : memref<1x1x32xf32, #tpu.memory_space<vmem>>, vector<1x1x32xf32>
    %6 = vector.shape_cast %5 : vector<1x1x32xf32> to vector<1x32xf32>
    %c0_6 = arith.constant 0 : index
    %c0_7 = arith.constant 0 : index
    %c0_8 = arith.constant 0 : index
    %7 = vector.load %arg4[%c0_6, %c0_7, %c0_8] : memref<1x1x32xf32, #tpu.memory_space<vmem>>, vector<1x1x32xf32>
    %8 = vector.shape_cast %7 : vector<1x1x32xf32> to vector<1x32xf32>
    %cst = arith.constant dense<0.000000e+00> : vector<16xf32>
    %9 = vector.multi_reduction <add>, %4, %cst [1] : vector<16x32xf32> to vector<16xf32>
    %10 = vector.shape_cast %9 : vector<16xf32> to vector<16x1xf32>
    %cst_9 = arith.constant 3.200000e+01 : f32
    %11 = vector.broadcast %cst_9 : f32 to vector<16x1xf32>
    %12 = arith.divf %10, %11 : vector<16x1xf32>
    %13 = vector.broadcast %12 : vector<16x1xf32> to vector<16x32xf32>
    %14 = arith.subf %4, %13 : vector<16x32xf32>
    %15 = arith.mulf %14, %14 : vector<16x32xf32>
    %cst_10 = arith.constant dense<0.000000e+00> : vector<16xf32>
    %16 = vector.multi_reduction <add>, %15, %cst_10 [1] : vector<16x32xf32> to vector<16xf32>
    %17 = vector.shape_cast %16 : vector<16xf32> to vector<16x1xf32>
    %cst_11 = arith.constant 3.200000e+01 : f32
    %18 = vector.broadcast %cst_11 : f32 to vector<16x1xf32>
    %19 = arith.divf %17, %18 : vector<16x1xf32>
    %20 = vector.broadcast %12 : vector<16x1xf32> to vector<16x32xf32>
    %21 = arith.subf %4, %20 : vector<16x32xf32>
    %cst_12 = arith.constant 9.99999974E-6 : f32
    %22 = vector.broadcast %cst_12 : f32 to vector<16x1xf32>
    %23 = arith.addf %19, %22 : vector<16x1xf32>
    %24 = math.rsqrt %23 : vector<16x1xf32>
    %25 = vector.broadcast %24 : vector<16x1xf32> to vector<16x32xf32>
    %26 = arith.mulf %21, %25 : vector<16x32xf32>
    %27 = vector.broadcast %6 : vector<1x32xf32> to vector<16x32xf32>
    %28 = arith.mulf %26, %27 : vector<16x32xf32>
    %29 = vector.broadcast %8 : vector<1x32xf32> to vector<16x32xf32>
    %30 = arith.addf %28, %29 : vector<16x32xf32>
    %31 = arith.truncf %30 : vector<16x32xf32> to vector<16x32xbf16>
    %c0_13 = arith.constant 0 : index
    %c0_14 = arith.constant 0 : index
    %c0_15 = arith.constant 0 : index
    %32 = vector.load %arg5[%c0_13, %c0_14, %c0_15] : memref<1x32x96xbf16, #tpu.memory_space<vmem>>, vector<1x32x96xbf16>
    %33 = vector.shape_cast %32 : vector<1x32x96xbf16> to vector<32x96xbf16>
    %cst_16 = arith.constant dense<0.000000e+00> : vector<16x96xf32>
    %34 = tpu.matmul %31, %33, %cst_16 {dimension_numbers = #tpu.dot_dimension_numbers<[1], [0], [0], [1], [0, 0, 1, 1], [], []>} : vector<16x32xbf16>, vector<32x96xbf16>, vector<16x96xf32> -> vector<16x96xf32>
    %35 = vector.extract_strided_slice %34 {offsets = [0, 0], sizes = [16, 8], strides = [1, 1]} : vector<16x96xf32> to vector<16x8xf32>
    %36 = vector.shape_cast %35 : vector<16x8xf32> to vector<2x8x8xf32>
    %37 = vector.extract_strided_slice %34 {offsets = [0, 8], sizes = [16, 8], strides = [1, 1]} : vector<16x96xf32> to vector<16x8xf32>
    %38 = vector.shape_cast %37 : vector<16x8xf32> to vector<2x8x8xf32>
    %39 = vector.extract_strided_slice %34 {offsets = [0, 16], sizes = [16, 8], strides = [1, 1]} : vector<16x96xf32> to vector<16x8xf32>
    %40 = vector.shape_cast %39 : vector<16x8xf32> to vector<2x8x8xf32>
    %41 = vector.extract_strided_slice %34 {offsets = [0, 24], sizes = [16, 8], strides = [1, 1]} : vector<16x96xf32> to vector<16x8xf32>
    %42 = vector.shape_cast %41 : vector<16x8xf32> to vector<2x8x8xf32>
    %43 = vector.shape_cast %36 : vector<2x8x8xf32> to vector<1x2x8x8xf32>
    %44 = vector.shape_cast %38 : vector<2x8x8xf32> to vector<1x2x8x8xf32>
    %45 = vector.shape_cast %40 : vector<2x8x8xf32> to vector<1x2x8x8xf32>
    %46 = vector.shape_cast %42 : vector<2x8x8xf32> to vector<1x2x8x8xf32>
    %47 = tpu.concatenate %43, %44, %45, %46 in 0 : vector<1x2x8x8xf32>, vector<1x2x8x8xf32>, vector<1x2x8x8xf32>, vector<1x2x8x8xf32> -> vector<4x2x8x8xf32>
    %48 = vector.shape_cast %47 : vector<4x2x8x8xf32> to vector<8x8x8xf32>
    %49 = arith.truncf %48 : vector<8x8x8xf32> to vector<8x8x8xbf16>
    %50 = vector.extract_strided_slice %34 {offsets = [0, 32], sizes = [16, 8], strides = [1, 1]} : vector<16x96xf32> to vector<16x8xf32>
    %51 = vector.shape_cast %50 : vector<16x8xf32> to vector<2x8x8xf32>
    %52 = vector.extract_strided_slice %34 {offsets = [0, 40], sizes = [16, 8], strides = [1, 1]} : vector<16x96xf32> to vector<16x8xf32>
    %53 = vector.shape_cast %52 : vector<16x8xf32> to vector<2x8x8xf32>
    %54 = vector.extract_strided_slice %34 {offsets = [0, 48], sizes = [16, 8], strides = [1, 1]} : vector<16x96xf32> to vector<16x8xf32>
    %55 = vector.shape_cast %54 : vector<16x8xf32> to vector<2x8x8xf32>
    %56 = vector.extract_strided_slice %34 {offsets = [0, 56], sizes = [16, 8], strides = [1, 1]} : vector<16x96xf32> to vector<16x8xf32>
    %57 = vector.shape_cast %56 : vector<16x8xf32> to vector<2x8x8xf32>
    %58 = vector.shape_cast %51 : vector<2x8x8xf32> to vector<1x2x8x8xf32>
    %59 = vector.shape_cast %53 : vector<2x8x8xf32> to vector<1x2x8x8xf32>
    %60 = vector.shape_cast %55 : vector<2x8x8xf32> to vector<1x2x8x8xf32>
    %61 = vector.shape_cast %57 : vector<2x8x8xf32> to vector<1x2x8x8xf32>
    %62 = tpu.concatenate %58, %59, %60, %61 in 0 : vector<1x2x8x8xf32>, vector<1x2x8x8xf32>, vector<1x2x8x8xf32>, vector<1x2x8x8xf32> -> vector<4x2x8x8xf32>
    %63 = vector.shape_cast %62 : vector<4x2x8x8xf32> to vector<8x8x8xf32>
    %64 = arith.truncf %63 : vector<8x8x8xf32> to vector<8x8x8xbf16>
    %65 = vector.extract_strided_slice %34 {offsets = [0, 64], sizes = [16, 8], strides = [1, 1]} : vector<16x96xf32> to vector<16x8xf32>
    %66 = vector.shape_cast %65 : vector<16x8xf32> to vector<2x8x8xf32>
    %67 = vector.extract_strided_slice %34 {offsets = [0, 72], sizes = [16, 8], strides = [1, 1]} : vector<16x96xf32> to vector<16x8xf32>
    %68 = vector.shape_cast %67 : vector<16x8xf32> to vector<2x8x8xf32>
    %69 = vector.extract_strided_slice %34 {offsets = [0, 80], sizes = [16, 8], strides = [1, 1]} : vector<16x96xf32> to vector<16x8xf32>
    %70 = vector.shape_cast %69 : vector<16x8xf32> to vector<2x8x8xf32>
    %71 = vector.extract_strided_slice %34 {offsets = [0, 88], sizes = [16, 8], strides = [1, 1]} : vector<16x96xf32> to vector<16x8xf32>
    %72 = vector.shape_cast %71 : vector<16x8xf32> to vector<2x8x8xf32>
    %73 = vector.shape_cast %66 : vector<2x8x8xf32> to vector<1x2x8x8xf32>
    %74 = vector.shape_cast %68 : vector<2x8x8xf32> to vector<1x2x8x8xf32>
    %75 = vector.shape_cast %70 : vector<2x8x8xf32> to vector<1x2x8x8xf32>
    %76 = vector.shape_cast %72 : vector<2x8x8xf32> to vector<1x2x8x8xf32>
    %77 = tpu.concatenate %73, %74, %75, %76 in 0 : vector<1x2x8x8xf32>, vector<1x2x8x8xf32>, vector<1x2x8x8xf32>, vector<1x2x8x8xf32> -> vector<4x2x8x8xf32>
    %78 = vector.shape_cast %77 : vector<4x2x8x8xf32> to vector<8x8x8xf32>
    %79 = arith.truncf %78 : vector<8x8x8xf32> to vector<8x8x8xbf16>
    "tpu.trace_start"() <{level = 10 : i32, message = "gnd,gmd->gnm"}> : () -> ()
    %cst_17 = arith.constant dense<0.000000e+00> : vector<8x8x8xf32>
    %80 = tpu.matmul %49, %64, %cst_17 {dimension_numbers = #tpu.dot_dimension_numbers<[2], [2], [1], [1], [0, 0, 0, 1, 1, 1], [0], [0]>} : vector<8x8x8xbf16>, vector<8x8x8xbf16>, vector<8x8x8xf32> -> vector<8x8x8xf32>
    "tpu.trace_stop"() : () -> ()
    %cst_18 = arith.constant dense<0xFF800000> : vector<8x8xf32>
    %81 = vector.multi_reduction <maximumf>, %80, %cst_18 [2] : vector<8x8x8xf32> to vector<8x8xf32>
    %82 = vector.shape_cast %81 : vector<8x8xf32> to vector<8x8x1xf32>
    %83 = vector.broadcast %82 : vector<8x8x1xf32> to vector<8x8x8xf32>
    %84 = arith.subf %80, %83 : vector<8x8x8xf32>
    %85 = math.exp %84 : vector<8x8x8xf32>
    %cst_19 = arith.constant dense<0.000000e+00> : vector<8x8xf32>
    %86 = vector.multi_reduction <add>, %85, %cst_19 [2] : vector<8x8x8xf32> to vector<8x8xf32>
    %87 = vector.shape_cast %86 : vector<8x8xf32> to vector<8x8x1xf32>
    %88 = tpu.reciprocal %87 {approx = true} : vector<8x8x1xf32> -> vector<8x8x1xf32>
    %89 = vector.broadcast %88 : vector<8x8x1xf32> to vector<8x8x8xf32>
    %90 = arith.mulf %85, %89 : vector<8x8x8xf32>
    %91 = arith.truncf %90 : vector<8x8x8xf32> to vector<8x8x8xbf16>
    "tpu.trace_start"() <{level = 10 : i32, message = "gnm,gmd->gnd"}> : () -> ()
    %cst_20 = arith.constant dense<0.000000e+00> : vector<8x8x8xf32>
    %92 = tpu.matmul %91, %79, %cst_20 {dimension_numbers = #tpu.dot_dimension_numbers<[2], [1], [1], [2], [0, 0, 0, 1, 1, 2], [0], [0]>} : vector<8x8x8xbf16>, vector<8x8x8xbf16>, vector<8x8x8xf32> -> vector<8x8x8xf32>
    "tpu.trace_stop"() : () -> ()
    %93 = vector.shape_cast %92 : vector<8x8x8xf32> to vector<4x16x8xf32>
    %94 = vector.extract_strided_slice %93 {offsets = [0, 0, 0], sizes = [1, 16, 8], strides = [1, 1, 1]} : vector<4x16x8xf32> to vector<1x16x8xf32>
    %95 = vector.shape_cast %94 : vector<1x16x8xf32> to vector<16x8xf32>
    %96 = vector.extract_strided_slice %93 {offsets = [1, 0, 0], sizes = [1, 16, 8], strides = [1, 1, 1]} : vector<4x16x8xf32> to vector<1x16x8xf32>
    %97 = vector.shape_cast %96 : vector<1x16x8xf32> to vector<16x8xf32>
    %98 = vector.extract_strided_slice %93 {offsets = [2, 0, 0], sizes = [1, 16, 8], strides = [1, 1, 1]} : vector<4x16x8xf32> to vector<1x16x8xf32>
    %99 = vector.shape_cast %98 : vector<1x16x8xf32> to vector<16x8xf32>
    %100 = vector.extract_strided_slice %93 {offsets = [3, 0, 0], sizes = [1, 16, 8], strides = [1, 1, 1]} : vector<4x16x8xf32> to vector<1x16x8xf32>
    %101 = vector.shape_cast %100 : vector<1x16x8xf32> to vector<16x8xf32>
    %102 = tpu.concatenate %95, %97, %99, %101 in 1 : vector<16x8xf32>, vector<16x8xf32>, vector<16x8xf32>, vector<16x8xf32> -> vector<16x32xf32>
    %103 = arith.truncf %102 : vector<16x32xf32> to vector<16x32xbf16>
    %c0_21 = arith.constant 0 : index
    %c0_22 = arith.constant 0 : index
    %c0_23 = arith.constant 0 : index
    %104 = vector.load %arg6[%c0_21, %c0_22, %c0_23] : memref<1x32x32xbf16, #tpu.memory_space<vmem>>, vector<1x32x32xbf16>
    %105 = vector.shape_cast %104 : vector<1x32x32xbf16> to vector<32x32xbf16>
    %cst_24 = arith.constant dense<0.000000e+00> : vector<16x32xf32>
    %106 = tpu.matmul %103, %105, %cst_24 {dimension_numbers = #tpu.dot_dimension_numbers<[1], [0], [0], [1], [0, 0, 1, 1], [], []>} : vector<16x32xbf16>, vector<32x32xbf16>, vector<16x32xf32> -> vector<16x32xf32>
    %107 = arith.addf %106, %4 : vector<16x32xf32>
    %c0_25 = arith.constant 0 : index
    %c0_26 = arith.constant 0 : index
    %c0_27 = arith.constant 0 : index
    %108 = vector.load %arg7[%c0_25, %c0_26, %c0_27] : memref<1x1x32xf32, #tpu.memory_space<vmem>>, vector<1x1x32xf32>
    %109 = vector.shape_cast %108 : vector<1x1x32xf32> to vector<1x32xf32>
    %c0_28 = arith.constant 0 : index
    %c0_29 = arith.constant 0 : index
    %c0_30 = arith.constant 0 : index
    %110 = vector.load %arg8[%c0_28, %c0_29, %c0_30] : memref<1x1x32xf32, #tpu.memory_space<vmem>>, vector<1x1x32xf32>
    %111 = vector.shape_cast %110 : vector<1x1x32xf32> to vector<1x32xf32>
    %cst_31 = arith.constant dense<0.000000e+00> : vector<16xf32>
    %112 = vector.multi_reduction <add>, %107, %cst_31 [1] : vector<16x32xf32> to vector<16xf32>
    %113 = vector.shape_cast %112 : vector<16xf32> to vector<16x1xf32>
    %cst_32 = arith.constant 3.200000e+01 : f32
    %114 = vector.broadcast %cst_32 : f32 to vector<16x1xf32>
    %115 = arith.divf %113, %114 : vector<16x1xf32>
    %116 = vector.broadcast %115 : vector<16x1xf32> to vector<16x32xf32>
    %117 = arith.subf %107, %116 : vector<16x32xf32>
    %118 = arith.mulf %117, %117 : vector<16x32xf32>
    %cst_33 = arith.constant dense<0.000000e+00> : vector<16xf32>
    %119 = vector.multi_reduction <add>, %118, %cst_33 [1] : vector<16x32xf32> to vector<16xf32>
    %120 = vector.shape_cast %119 : vector<16xf32> to vector<16x1xf32>
    %cst_34 = arith.constant 3.200000e+01 : f32
    %121 = vector.broadcast %cst_34 : f32 to vector<16x1xf32>
    %122 = arith.divf %120, %121 : vector<16x1xf32>
    %123 = vector.broadcast %115 : vector<16x1xf32> to vector<16x32xf32>
    %124 = arith.subf %107, %123 : vector<16x32xf32>
    %cst_35 = arith.constant 9.99999974E-6 : f32
    %125 = vector.broadcast %cst_35 : f32 to vector<16x1xf32>
    %126 = arith.addf %122, %125 : vector<16x1xf32>
    %127 = math.rsqrt %126 : vector<16x1xf32>
    %128 = vector.broadcast %127 : vector<16x1xf32> to vector<16x32xf32>
    %129 = arith.mulf %124, %128 : vector<16x32xf32>
    %130 = vector.broadcast %109 : vector<1x32xf32> to vector<16x32xf32>
    %131 = arith.mulf %129, %130 : vector<16x32xf32>
    %132 = vector.broadcast %111 : vector<1x32xf32> to vector<16x32xf32>
    %133 = arith.addf %131, %132 : vector<16x32xf32>
    %134 = arith.truncf %133 : vector<16x32xf32> to vector<16x32xbf16>
    %c0_36 = arith.constant 0 : index
    %c0_37 = arith.constant 0 : index
    %c0_38 = arith.constant 0 : index
    %135 = vector.load %arg9[%c0_36, %c0_37, %c0_38] : memref<1x32x64xbf16, #tpu.memory_space<vmem>>, vector<1x32x64xbf16>
    %136 = vector.shape_cast %135 : vector<1x32x64xbf16> to vector<32x64xbf16>
    %cst_39 = arith.constant dense<0.000000e+00> : vector<16x64xf32>
    %137 = tpu.matmul %134, %136, %cst_39 {dimension_numbers = #tpu.dot_dimension_numbers<[1], [0], [0], [1], [0, 0, 1, 1], [], []>} : vector<16x32xbf16>, vector<32x64xbf16>, vector<16x64xf32> -> vector<16x64xf32>
    %c0_40 = arith.constant 0 : index
    %c0_41 = arith.constant 0 : index
    %c0_42 = arith.constant 0 : index
    %138 = vector.load %arg10[%c0_40, %c0_41, %c0_42] : memref<1x1x64xf32, #tpu.memory_space<vmem>>, vector<1x1x64xf32>
    %139 = vector.shape_cast %138 : vector<1x1x64xf32> to vector<1x64xf32>
    %140 = vector.broadcast %139 : vector<1x64xf32> to vector<16x64xf32>
    %141 = arith.addf %137, %140 : vector<16x64xf32>
    %cst_43 = arith.constant 5.000000e-01 : f32
    %142 = vector.broadcast %cst_43 : f32 to vector<16x64xf32>
    %143 = arith.mulf %142, %141 : vector<16x64xf32>
    %cst_44 = arith.constant 0.707106769 : f32
    %144 = vector.broadcast %cst_44 : f32 to vector<16x64xf32>
    %145 = arith.mulf %141, %144 : vector<16x64xf32>
    %146 = math.erf %145 : vector<16x64xf32>
    %cst_45 = arith.constant 1.000000e+00 : f32
    %147 = vector.broadcast %cst_45 : f32 to vector<16x64xf32>
    %148 = arith.addf %147, %146 : vector<16x64xf32>
    %149 = arith.mulf %143, %148 : vector<16x64xf32>
    %150 = arith.truncf %149 : vector<16x64xf32> to vector<16x64xbf16>
    %c0_46 = arith.constant 0 : index
    %c0_47 = arith.constant 0 : index
    %c0_48 = arith.constant 0 : index
    %151 = vector.load %arg11[%c0_46, %c0_47, %c0_48] : memref<1x64x32xbf16, #tpu.memory_space<vmem>>, vector<1x64x32xbf16>
    %152 = vector.shape_cast %151 : vector<1x64x32xbf16> to vector<64x32xbf16>
    %cst_49 = arith.constant dense<0.000000e+00> : vector<16x32xf32>
    %153 = tpu.matmul %150, %152, %cst_49 {dimension_numbers = #tpu.dot_dimension_numbers<[1], [0], [0], [1], [0, 0, 1, 1], [], []>} : vector<16x64xbf16>, vector<64x32xbf16>, vector<16x32xf32> -> vector<16x32xf32>
    %c0_50 = arith.constant 0 : index
    %c0_51 = arith.constant 0 : index
    %c0_52 = arith.constant 0 : index
    %154 = vector.load %arg12[%c0_50, %c0_51, %c0_52] : memref<1x1x32xf32, #tpu.memory_space<vmem>>, vector<1x1x32xf32>
    %155 = vector.shape_cast %154 : vector<1x1x32xf32> to vector<1x32xf32>
    %156 = vector.broadcast %155 : vector<1x32xf32> to vector<16x32xf32>
    %157 = arith.addf %153, %156 : vector<16x32xf32>
    %158 = arith.addf %157, %107 : vector<16x32xf32>
    %159 = vector.shape_cast %158 : vector<16x32xf32> to vector<2x8x32xf32>
    %c0_53 = arith.constant 0 : index
    %c0_54 = arith.constant 0 : index
    %c0_55 = arith.constant 0 : index
    %160 = vector.load %arg16[%c0_53, %c0_54, %c0_55] : memref<2x8x32xf32, #tpu.memory_space<vmem>>, vector<2x8x32xf32>
    tpu.vector_store %arg16[%c0_53, %c0_54, %c0_55], %159 {strides = array<i32>} : memref<2x8x32xf32, #tpu.memory_space<vmem>>, vector<2x8x32xf32>,
    %c1_i32 = arith.constant 1 : i32
    %161 = arith.cmpi eq, %arg1, %c1_i32 : i32
    %162 = arith.extui %161 : i1 to i32
    %c0_i32_56 = arith.constant 0 : i32
    %163 = arith.cmpi ne, %162, %c0_i32_56 : i32
    scf.if %163 {
      %c0_57 = arith.constant 0 : index
      %c0_58 = arith.constant 0 : index
      %164 = vector.load %arg13[%c0_57, %c0_58] : memref<1x32xf32, #tpu.memory_space<vmem>>, vector<1x32xf32>
      %c0_59 = arith.constant 0 : index
      %c0_60 = arith.constant 0 : index
      %165 = vector.load %arg14[%c0_59, %c0_60] : memref<1x32xf32, #tpu.memory_space<vmem>>, vector<1x32xf32>
      %cst_61 = arith.constant dense<0.000000e+00> : vector<16xf32>
      %166 = vector.multi_reduction <add>, %158, %cst_61 [1] : vector<16x32xf32> to vector<16xf32>
      %167 = vector.shape_cast %166 : vector<16xf32> to vector<16x1xf32>
      %cst_62 = arith.constant 3.200000e+01 : f32
      %168 = vector.broadcast %cst_62 : f32 to vector<16x1xf32>
      %169 = arith.divf %167, %168 : vector<16x1xf32>
      %170 = vector.broadcast %169 : vector<16x1xf32> to vector<16x32xf32>
      %171 = arith.subf %158, %170 : vector<16x32xf32>
      %172 = arith.mulf %171, %171 : vector<16x32xf32>
      %cst_63 = arith.constant dense<0.000000e+00> : vector<16xf32>
      %173 = vector.multi_reduction <add>, %172, %cst_63 [1] : vector<16x32xf32> to vector<16xf32>
      %174 = vector.shape_cast %173 : vector<16xf32> to vector<16x1xf32>
      %cst_64 = arith.constant 3.200000e+01 : f32
      %175 = vector.broadcast %cst_64 : f32 to vector<16x1xf32>
      %176 = arith.divf %174, %175 : vector<16x1xf32>
      %177 = vector.broadcast %169 : vector<16x1xf32> to vector<16x32xf32>
      %178 = arith.subf %158, %177 : vector<16x32xf32>
      %cst_65 = arith.constant 9.99999974E-6 : f32
      %179 = vector.broadcast %cst_65 : f32 to vector<16x1xf32>
      %180 = arith.addf %176, %179 : vector<16x1xf32>
      %181 = math.rsqrt %180 : vector<16x1xf32>
      %182 = vector.broadcast %181 : vector<16x1xf32> to vector<16x32xf32>
      %183 = arith.mulf %178, %182 : vector<16x32xf32>
      %184 = vector.broadcast %164 : vector<1x32xf32> to vector<16x32xf32>
      %185 = arith.mulf %183, %184 : vector<16x32xf32>
      %186 = vector.broadcast %165 : vector<1x32xf32> to vector<16x32xf32>
      %187 = arith.addf %185, %186 : vector<16x32xf32>
      %188 = vector.shape_cast %187 : vector<16x32xf32> to vector<2x8x32xf32>
      %c0_66 = arith.constant 0 : index
      %c0_67 = arith.constant 0 : index
      %c0_68 = arith.constant 0 : index
      %189 = vector.load %arg15[%c0_66, %c0_67, %c0_68] : memref<2x8x32xf32, #tpu.memory_space<vmem>>, vector<2x8x32xf32>
      tpu.vector_store %arg15[%c0_66, %c0_67, %c0_68], %188 {strides = array<i32>} : memref<2x8x32xf32, #tpu.memory_space<vmem>>, vector<2x8x32xf32>,
    } else {
    }
    return
  }
  func.func @transform_0(%arg0: i32, %arg1: i32) -> (i32, i32, i32) {
    %c0_i32 = arith.constant 0 : i32
    %c0_i32_0 = arith.constant 0 : i32
    %c0_i32_1 = arith.constant 0 : i32
    return %arg0, %c0_i32, %c0_i32_0 : i32, i32, i32
  }
  func.func @transform_1(%arg0: i32, %arg1: i32) -> (i32, i32, i32) {
    %c0_i32 = arith.constant 0 : i32
    %c0_i32_0 = arith.constant 0 : i32
    %c0_i32_1 = arith.constant 0 : i32
    return %arg1, %c0_i32, %c0_i32_0 : i32, i32, i32
  }
  func.func @transform_2(%arg0: i32, %arg1: i32) -> (i32, i32, i32) {
    %c0_i32 = arith.constant 0 : i32
    %c0_i32_0 = arith.constant 0 : i32
    %c0_i32_1 = arith.constant 0 : i32
    return %arg1, %c0_i32, %c0_i32_0 : i32, i32, i32
  }
  func.func @transform_3(%arg0: i32, %arg1: i32) -> (i32, i32, i32) {
    %c0_i32 = arith.constant 0 : i32
    %c0_i32_0 = arith.constant 0 : i32
    %c0_i32_1 = arith.constant 0 : i32
    return %arg1, %c0_i32, %c0_i32_0 : i32, i32, i32
  }
  func.func @transform_4(%arg0: i32, %arg1: i32) -> (i32, i32, i32) {
    %c0_i32 = arith.constant 0 : i32
    %c0_i32_0 = arith.constant 0 : i32
    %c0_i32_1 = arith.constant 0 : i32
    return %arg1, %c0_i32, %c0_i32_0 : i32, i32, i32
  }
  func.func @transform_5(%arg0: i32, %arg1: i32) -> (i32, i32, i32) {
    %c0_i32 = arith.constant 0 : i32
    %c0_i32_0 = arith.constant 0 : i32
    %c0_i32_1 = arith.constant 0 : i32
    return %arg1, %c0_i32, %c0_i32_0 : i32, i32, i32
  }
  func.func @transform_6(%arg0: i32, %arg1: i32) -> (i32, i32, i32) {
    %c0_i32 = arith.constant 0 : i32
    %c0_i32_0 = arith.constant 0 : i32
    %c0_i32_1 = arith.constant 0 : i32
    return %arg1, %c0_i32, %c0_i32_0 : i32, i32, i32
  }
  func.func @transform_7(%arg0: i32, %arg1: i32) -> (i32, i32, i32) {
    %c0_i32 = arith.constant 0 : i32
    %c0_i32_0 = arith.constant 0 : i32
    %c0_i32_1 = arith.constant 0 : i32
    return %arg1, %c0_i32, %c0_i32_0 : i32, i32, i32
  }
  func.func @transform_8(%arg0: i32, %arg1: i32) -> (i32, i32, i32) {
    %c0_i32 = arith.constant 0 : i32
    %c0_i32_0 = arith.constant 0 : i32
    %c0_i32_1 = arith.constant 0 : i32
    return %arg1, %c0_i32, %c0_i32_0 : i32, i32, i32
  }
  func.func @transform_9(%arg0: i32, %arg1: i32) -> (i32, i32, i32) {
    %c0_i32 = arith.constant 0 : i32
    %c0_i32_0 = arith.constant 0 : i32
    %c0_i32_1 = arith.constant 0 : i32
    return %arg1, %c0_i32, %c0_i32_0 : i32, i32, i32
  }
  func.func @transform_10(%arg0: i32, %arg1: i32) -> (i32, i32, i32) {
    %c0_i32 = arith.constant 0 : i32
    %c0_i32_0 = arith.constant 0 : i32
    %c0_i32_1 = arith.constant 0 : i32
    return %arg1, %c0_i32, %c0_i32_0 : i32, i32, i32
  }
  func.func @transform_11(%arg0: i32, %arg1: i32) -> (i32, i32) {
    %c0_i32 = arith.constant 0 : i32
    %c0_i32_0 = arith.constant 0 : i32
    %c0_i32_1 = arith.constant 0 : i32
    return %c0_i32, %c0_i32_0 : i32, i32
  }
  func.func @transform_12(%arg0: i32, %arg1: i32) -> (i32, i32) {
    %c0_i32 = arith.constant 0 : i32
    %c0_i32_0 = arith.constant 0 : i32
    %c0_i32_1 = arith.constant 0 : i32
    return %c0_i32, %c0_i32_0 : i32, i32
  }
  func.func @transform_13(%arg0: i32, %arg1: i32) -> (i32, i32, i32) {
    %c0_i32 = arith.constant 0 : i32
    %c0_i32_0 = arith.constant 0 : i32
    %c0_i32_1 = arith.constant 0 : i32
    return %arg0, %c0_i32, %c0_i32_0 : i32, i32, i32
  }
}

</mosaic_0001>

<bundles_post_ra>
// kernel: tpu_custom_call.1
= control target key start
LH: loop header
LB: loop body
LE: loop exit
PB: predicated region body
PF: predicated region fallthrough
CT: control target
= control target key end

     0   :  { %s3625_s0 = inlined_call_operand.hbm [shape: f32[2,8,32], index: 0, kind: input, shape index: {}]   ;;  %s3626_s1 = inlined_call_operand.vmem [shape: f32[2,1,32], index: 1, kind: input, shape index: {}]   ;;  %s3627_s2 = inlined_call_operand.hbm [shape: f32[2,1,32], index: 2, kind: input, shape index: {}]   ;;  %s3628_s3 = inlined_call_operand.vmem [shape: bf16[2,32,96], index: 3, kind: input, shape index: {}]   ;;  %s3629_s4 = inlined_call_operand.vmem [shape: bf16[2,32,32], index: 4, kind: input, shape index: {}]   ;;  %s3630_s5 = inlined_call_operand.hbm [shape: f32[2,1,32], index: 5, kind: input, shape index: {}]   ;;  %s3631_s6 = inlined_call_operand.hbm [shape: f32[2,1,32], index: 6, kind: input, shape index: {}]   ;;  %s3632_s7 = inlined_call_operand.vmem [shape: bf16[2,32,64], index: 7, kind: input, shape index: {}]   ;;  %s3633_s8 = inlined_call_operand.hbm [shape: f32[2,1,64], index: 8, kind: input, shape index: {}]   ;;  %s3634_s9 = inlined_call_operand.vmem [shape: bf16[2,64,32], index: 9, kind: input, shape index: {}]   ;;  %s3635_s10 = inlined_call_operand.vmem [shape: f32[2,1,32], index: 10, kind: input, shape index: {}]   ;;  %s3636_s11 = inlined_call_operand.vmem [shape: f32[1,32], index: 11, kind: input, shape index: {}]   ;;  %s3637_s12 = inlined_call_operand.vmem [shape: f32[1,32], index: 12, kind: input, shape index: {}]   ;;  %s3638_s13 = inlined_call_operand.hbm [shape: f32[2,8,32], index: 13, kind: output, shape index: {}]  }
   0x1   :  { %3651 = sst [smem:[#allocation22_spill]] %s3627_s2 }
   0x2   :  { %3652 = sst [smem:[#allocation23_spill]] %s3631_s6 }
   0x3   :  { %3653 = sst [smem:[#allocation24_spill]] %s3632_s7 }
   0x4   :  { %3654 = sst [smem:[#allocation25_spill]] %s3634_s9 }
   0x5   :  { %3655 = sst [smem:[#allocation26_spill]] %s3635_s10 }
   0x6   :  { %3656 = sst [smem:[#allocation27_spill]] %s3636_s11 }
   0x7   :  { %3657 = sst [smem:[#allocation28_spill]] %s3637_s12 }
   0x8   :  { %3658 = sst [smem:[#allocation29_spill]] %s3638_s13 }
   0x9   :  { %18 = vsyncpa [#allocation4], 0 }
   0xa   :  { %19 = vsyncpa [#allocation7], 0 }
   0xb   :  { %21 = vsyncpa [#allocation7 + $0x1], 0 }
   0xc   :  { %22 = vsyncpa [#allocation10], 0 }
   0xd   :  { %24 = vsyncpa [#allocation10 + $0x1], 0 }
   0xe   :  { %25 = vsyncpa [#allocation5], 0  ;;  %s3026_s25 = smov 0   ;;  %s3028_s26 = smov 0  }
   0xf   :  { %s3030_s27 = smov 0   ;;  %s3032_s28 = smov 0  }
  0x10   :  { %s3034_s29 = smov 0   ;;  %s3036_s30 = smov 0  }
  0x11 LB: > { %3659 = sst [smem:[#allocation17_spill]] %s2923_s27  ;;  %s40_s14 = sadd.s32 1, %s2931_s29  ;;  %s2935_s30 = sphi %s3036_s30, %s31_s30   ;;  %s2931_s29 = sphi %s3034_s29, %s3695_s29   ;;  %s2927_s28 = sphi %s3032_s28, %s3694_s28   ;;  %s2923_s27 = sphi %s3030_s27, %s3693_s27   ;;  %s2919_s26 = sphi %s3028_s26, %s3697_s26   ;;  %s2915_s25 = sphi %s3026_s25, %s3696_s25  }
  0x12   : > { %3660 = sst [smem:[#allocation18_spill]] %s2931_s29  ;;  %s102_s15 = sadd.s32 1, %s2923_s27 }
  0x13   : > { %3661 = sst [smem:[#allocation19_spill]] %s2935_s30  ;;  %p41_p0 = scmp.ge.s32.totalorder %s40_s14, 2 }
  0x14   : > { %p109_p1 = scmp.ne.s32.totalorder %s2923_s27, %s2919_s26  ;;  %p110_p2 = scmp.eq.s32.totalorder %s2935_s30, 0 }
  0x15   : > { %s3699_s14 = smov (%p41_p0, %s40_s14), 0  ;;  %p2544_p4 = scmp.lt.s32.totalorder %s2935_s30, 2 }
  0x16   : > { %3662 = sst [smem:[#allocation20_spill]] %s3699_s14  ;;  %p111_p3 = por %p110_p2, %p109_p1 }
  0x17   : > { %s99_s16 = ssub.s32 %s2931_s29, %s3699_s14  ;;  %s3068_s18 = sand.u32 1, %s2923_s27  }
  0x18   : > { %p100_p5 = scmp.eq.s32.totalorder %s99_s16, 0  ;;  %s3071_s19 = sshll.u32 %s2931_s29, 4 }
  0x19   : > { %s3664_s2 = sld [smem:[#allocation22_spill]]  ;;  %s446_s24 = scalar_lea.vmem [#allocation6], %s3068_s18 }
  0x1a   : > { %s3074_s20 = scalar_select %p100_p5, %s2923_s27, %s102_s15  }
  0x1b   : > { %s453_s17 = sshll.u32 %s446_s24, 4  ;;  %p3083_p6 = pnand %p2544_p4, %p111_p3  ;;  %s3087_s17 = int_to_ptr.vmem [resolvable:$true] %s453_s17 }
  0x1c   : > { %3663 = sst [smem:[#allocation21_spill]] %s3074_s20  ;;  %s3666_s15 = sand.u32 1, %s2935_s30  }
  0x1d   : > { %s3665_s16 = scalar_select %p3083_p6, 1, 0 }
  0x1e   : > { %s3091_s14 = scalar_lea.sflag [#allocation7], %s3666_s15  ;;  %p3097_p8 = pneg %p3083_p6 }
  0x1f   : > { %s3080_s23 = scalar_lea.hbm %s3664_s2, %s3071_s19  ;;  %s2704_s20 = scalar_lea.hbm %s3664_s2, 32 }
  0x20   : > { %s2699_s29 = scalar_lea.hbm %s3080_s23, 16  ;;  %p2705_p11 = scmp.lt.u32.totalorder %s3080_s23, %s3664_s2 }
  0x21   : > { %p2700_p7 = scmp.ne.s32.totalorder %s3080_s23, %s2699_s29  ;;  %p2706_p12 = scmp.lt.u32.totalorder %s2704_s20, %s2699_s29 }
  0x22   : > { %s3667_s21 = scalar_select %p3097_p8, 1, 0 }
  0x23   : > { %p2702_p9 = pnand %p3097_p8, %p2700_p7  ;;  %p2707_p13 = por %p2706_p12, %p2705_p11 }
  0x24   : > { %p2708_p0 = scmp.lt.u32.totalorder %s2699_s29, %s3080_s23 }
  0x25   : > { %p2703_p10 = pneg %p2702_p9 }
  0x26   : > { %p2709_p1 = por %p2708_p0, %p2707_p13 }
  0x28   : > { %p2710_p2 = pnand %p2709_p1, %p2703_p10 }
  0x2a   : > { %2713 = shalt.err (!%p2710_p2)
}
  0x2b   : > { %s2714_s15 = scalar_lea.vmem %s3087_s17, 16  ;;  %s2937_s22 = smov [#allocation6]  }
  0x2c   : > { %p2715_p3 = scmp.ne.s32.totalorder %s3087_s17, %s2714_s15  ;;  %s2719_s24 = sshll.u32 %s2937_s22, 4  ;;  %s2720_s24 = int_to_ptr.vmem [resolvable:$false] %s2719_s24 }
  0x2d   : > { %s2721_s13 = scalar_lea.vmem %s2720_s24, 32  ;;  %p2722_p7 = scmp.lt.s32.totalorder %s3087_s17, %s2720_s24 }
  0x2e   : > { %p2717_p4 = pnand %p2715_p3, %p3097_p8  ;;  %p2723_p9 = scmp.lt.s32.totalorder %s2721_s13, %s2714_s15 }
  0x30   : > { %p2718_p5 = pneg %p2717_p4  ;;  %p2724_p11 = por %p2723_p9, %p2722_p7 }
  0x32   : > { %p2725_p12 = pnand %p2724_p11, %p2718_p5 }
  0x34   : > { %2728 = shalt.err (!%p2725_p12)
}
  0x35   : > { %2533 = dma.hbm_to_vmem [thread:$0]  (!%p3083_p6), %s3080_s23, 16, %s3087_s17, %s3091_s14  }
  0x36   : > { %s3668_s6 = sld [smem:[#allocation23_spill]]  ;;  %s496_s15 = scalar_lea.vmem [#allocation9], %s3068_s18 }
  0x37   : > { %s503_s22 = sshll.u32 %s496_s15, 4  ;;  %s3669_s24 = sand.u32 1, %s2935_s30   ;;  %s504_s22 = int_to_ptr.vmem [resolvable:$true] %s503_s22 }
  0x38   : > { %s3130_s13 = scalar_lea.sflag [#allocation10], %s3669_s24 }
  0x3c   : > { %s3125_s20 = scalar_lea.hbm %s3668_s6, %s3071_s19  ;;  %s2734_s27 = scalar_lea.hbm %s3668_s6, 32 }
  0x3d   : > { %s2729_s2 = scalar_lea.hbm %s3125_s20, 16  ;;  %p2735_p1 = scmp.lt.u32.totalorder %s3125_s20, %s3668_s6 }
  0x3e   : > { %p2730_p10 = scmp.ne.s32.totalorder %s3125_s20, %s2729_s2  ;;  %p2736_p2 = scmp.lt.u32.totalorder %s2734_s27, %s2729_s2 }
  0x3f   : > { %p2738_p4 = scmp.lt.u32.totalorder %s2729_s2, %s3125_s20 }
  0x40   : > { %p2732_p13 = pnand %p2730_p10, %p3097_p8  ;;  %p2737_p3 = por %p2736_p2, %p2735_p1 }
  0x42   : > { %p2733_p0 = pneg %p2732_p13  ;;  %p2739_p5 = por %p2738_p4, %p2737_p3 }
  0x44   : > { %p2740_p7 = pnand %p2739_p5, %p2733_p0 }
  0x46   : > { %2743 = shalt.err (!%p2740_p7)
}
  0x47   : > { %s2744_s15 = scalar_lea.vmem %s504_s22, 16  ;;  %s2938_s24 = smov [#allocation9]  }
  0x48   : > { %p2745_p9 = scmp.ne.s32.totalorder %s504_s22, %s2744_s15  ;;  %s2749_s11 = sshll.u32 %s2938_s24, 4  ;;  %s2750_s11 = int_to_ptr.vmem [resolvable:$false] %s2749_s11 }
  0x49   : > { %s2751_s17 = scalar_lea.vmem %s2750_s11, 32  ;;  %p2752_p10 = scmp.lt.s32.totalorder %s504_s22, %s2750_s11 }
  0x4a   : > { %p2747_p11 = pnand %p2745_p9, %p3097_p8  ;;  %p2753_p13 = scmp.lt.s32.totalorder %s2751_s17, %s2744_s15 }
  0x4c   : > { %p2748_p12 = pneg %p2747_p11  ;;  %p2754_p6 = por %p2753_p13, %p2752_p10 }
  0x4e   : > { %p2755_p1 = pnand %p2754_p6, %p2748_p12 }
  0x50   : > { %2758 = shalt.err (!%p2755_p1)
}
  0x51   : > { %p3670_p2 = scmp.ne.s32.totalorder %s3665_s16, 0  ;;  %s3151_s2 = sadd.s32 4294967295, %s2935_s30  }
  0x52   : > { %p115_p0 = scmp.ne.s32.totalorder %s2919_s26, %s2915_s25  ;;  %p3646_p6 = scmp.eq.s32.totalorder %s3151_s2, 0 }
  0x53   : > { %2539 = dma.hbm_to_vmem [thread:$0]  (!%p3670_p2), %s3125_s20, 16, %s504_s22, %s3130_s13  }
  0x54   : > { %p2267_p3 = scmp.ge.s32.totalorder %s2935_s30, 1  ;;  %p402_p4 = scmp.lt.s32.totalorder %s2935_s30, 3 }
  0x55   : > { %p3160_p5 = por %p3646_p6, %p115_p0  ;;  %s2939_s20 = smov [#allocation3]  }
  0x56   : > { %p3164_p7 = pnand %p2267_p3, %p402_p4  ;;  %s417_s22 = sshll.u32 %s2939_s20, 4  ;;  %s418_s22 = int_to_ptr.vmem [resolvable:$true] %s417_s22 }
  0x57   : > { %s3671_s11 = scalar_select %p3160_p5, 1, 0 }
  0x58   : > { %s3672_s12 = scalar_select %p3164_p7, 1, 0 }
  0x59   : > { %p2526_p9 = pneg %p3164_p7  ;;  %s3180_s29 = scalar_lea.hbm %s3630_s5, %s3071_s19 }
  0x5a   : > { %s479_s15 = scalar_lea.vmem [#allocation8], %s3068_s18  ;;  %s2759_s6 = scalar_lea.hbm %s3625_s0, 256 }
  0x5b   : > { %p3172_p11 = pnand %p2526_p9, %p3646_p6  ;;  %s486_s24 = sshll.u32 %s479_s15, 4  ;;  %s3183_s24 = int_to_ptr.vmem [resolvable:$true] %s486_s24 }
  0x5c   : > { %p2760_p12 = scmp.ne.s32.totalorder %s3625_s0, %s2759_s6  ;;  %p2766_p0 = scmp.lt.u32.totalorder %s2759_s6, %s3625_s0 }
  0x5d   : > { %p2761_p10 = pneg %p3172_p11 }
  0x5f   : > { %p2762_p13 = pnand %p2761_p10, %p2760_p12 }
  0x61   : > { %p2763_p1 = pneg %p2762_p13 }
  0x63   : > { %p2768_p3 = pnand %p2766_p0, %p2763_p1 }
  0x65   : > { %2771 = shalt.err (!%p2768_p3)
}
  0x66   : > { %s2772_s15 = scalar_lea.vmem %s418_s22, 256  ;;  %p2780_p5 = scmp.lt.s32.totalorder %s418_s22, %s418_s22 }
  0x67   : > { %p2773_p4 = scmp.ne.s32.totalorder %s418_s22, %s2772_s15  ;;  %p2781_p7 = scmp.lt.s32.totalorder %s2772_s15, %s2772_s15 }
  0x69   : > { %p2775_p9 = pnand %p2773_p4, %p2761_p10  ;;  %p2782_p2 = por %p2781_p7, %p2780_p5 }
  0x6b   : > { %p2776_p6 = pneg %p2775_p9 }
  0x6d   : > { %p2783_p8 = pnand %p2782_p2, %p2776_p6 }
  0x6f   : > { %2786 = shalt.err (!%p2783_p8)
}
  0x70   : > { %s2940_s10 = smov 128   ;;  %s2941_s30 = smov 8  }
  0x71   : > { %2529 = dma.hbm_to_vmem [thread:$0]  (!%p3172_p11), %s3625_s0, 256, %s418_s22, [#allocation4], %s2940_s10, %s2940_s10, %s2941_s30  }
  0x72   : > { %s2787_s20 = scalar_lea.hbm %s3180_s29, 16  ;;  %p3674_p10 = scmp.ne.s32.totalorder %s3667_s21, 0 }
  0x73   : > { %p2788_p12 = scmp.ne.s32.totalorder %s3180_s29, %s2787_s20  ;;  %s2792_s15 = scalar_lea.hbm %s3630_s5, 32 }
  0x74   : > { %p2793_p8 = scmp.lt.u32.totalorder %s3180_s29, %s3630_s5  ;;  %p2794_p2 = scmp.lt.u32.totalorder %s2792_s15, %s2787_s20 }
  0x75   : > { %p2790_p13 = pnand %p2788_p12, %p3674_p10  ;;  %p2796_p7 = scmp.lt.u32.totalorder %s2787_s20, %s3180_s29 }
  0x76   : > { %p2795_p6 = por %p2794_p2, %p2793_p8 }
  0x77   : > { %p2791_p5 = pneg %p2790_p13 }
  0x78   : > { %p2797_p1 = por %p2796_p7, %p2795_p6 }
  0x7a   : > { %p2798_p0 = pnand %p2797_p1, %p2791_p5 }
  0x7c   : > { %2801 = shalt.err (!%p2798_p0)
}
  0x7d   : > { %s2802_s22 = scalar_lea.vmem %s3183_s24, 16  ;;  %s2942_s25 = smov [#allocation8]  }
  0x7e   : > { %p2803_p11 = scmp.ne.s32.totalorder %s3183_s24, %s2802_s22  ;;  %s2807_s10 = sshll.u32 %s2942_s25, 4  ;;  %s2808_s10 = int_to_ptr.vmem [resolvable:$false] %s2807_s10 }
  0x7f   : > { %s2809_s7 = scalar_lea.vmem %s2808_s10, 32  ;;  %p2810_p9 = scmp.lt.s32.totalorder %s3183_s24, %s2808_s10 }
  0x80   : > { %p2805_p3 = pnand %p2803_p11, %p3674_p10  ;;  %p2811_p12 = scmp.lt.s32.totalorder %s2809_s7, %s2802_s22 }
  0x82   : > { %p2806_p4 = pneg %p2805_p3  ;;  %p2812_p13 = por %p2811_p12, %p2810_p9 }
  0x84   : > { %p2813_p8 = pnand %p2812_p13, %p2806_p4 }
  0x86   : > { %2816 = shalt.err (!%p2813_p8)
}
  0x87   : > { %p3675_p5 = scmp.ne.s32.totalorder %s3665_s16, 0  ;;  %s3227_s6 = scalar_lea.hbm %s3633_s8, %s3071_s19 }
  0x88   : > { %s521_s17 = scalar_lea.vmem [#allocation11], %s3068_s18  ;;  %s2817_s23 = scalar_lea.hbm %s3227_s6, 16 }
  0x89   : > { %2536 = dma.hbm_to_vmem [thread:$0]  (!%p3675_p5), %s3180_s29, 16, %s3183_s24, %s3091_s14  }
  0x8a   : > { %s528_s20 = sshll.u32 %s521_s17, 4  ;;  %p2818_p2 = scmp.ne.s32.totalorder %s3227_s6, %s2817_s23  ;;  %s529_s20 = int_to_ptr.vmem [resolvable:$true] %s528_s20 }
  0x8b   : > { %s2822_s14 = scalar_lea.hbm %s3633_s8, 32  ;;  %p2823_p1 = scmp.lt.u32.totalorder %s3227_s6, %s3633_s8 }
  0x8c   : > { %p2820_p6 = pnand %p2818_p2, %p3674_p10  ;;  %p2824_p0 = scmp.lt.u32.totalorder %s2822_s14, %s2817_s23 }
  0x8d   : > { %p2826_p3 = scmp.lt.u32.totalorder %s2817_s23, %s3227_s6 }
  0x8e   : > { %p2821_p7 = pneg %p2820_p6  ;;  %p2825_p11 = por %p2824_p0, %p2823_p1 }
  0x90   : > { %p2827_p4 = por %p2826_p3, %p2825_p11 }
  0x92   : > { %p2828_p9 = pnand %p2827_p4, %p2821_p7 }
  0x94   : > { %2831 = shalt.err (!%p2828_p9)
}
  0x95   : > { %s2832_s18 = scalar_lea.vmem %s529_s20, 16  ;;  %s2943_s19 = smov [#allocation11]  }
  0x96   : > { %p2833_p12 = scmp.ne.s32.totalorder %s529_s20, %s2832_s18  ;;  %s2837_s22 = sshll.u32 %s2943_s19, 4  ;;  %s2838_s22 = int_to_ptr.vmem [resolvable:$false] %s2837_s22 }
  0x97   : > { %s2839_s25 = scalar_lea.vmem %s2838_s22, 32  ;;  %p2840_p2 = scmp.lt.s32.totalorder %s529_s20, %s2838_s22 }
  0x98   : > { %p2835_p13 = pnand %p2833_p12, %p3674_p10  ;;  %p2841_p6 = scmp.lt.s32.totalorder %s2839_s25, %s2832_s18 }
  0x9a   : > { %p2836_p8 = pneg %p2835_p13  ;;  %p2842_p5 = por %p2841_p6, %p2840_p2 }
  0x9c   : > { %p2843_p0 = pnand %p2842_p5, %p2836_p8 }
  0x9e   : > { %2846 = shalt.err (!%p2843_p0)
}
  0x9f   : > { %p3676_p1 = scmp.ne.s32.totalorder %s3665_s16, 0  ;;  %p3677_p7 = scmp.ne.s32.totalorder %s3672_s12, 0 }
  0xa0   : > { %p3678_p10 = scmp.eq.s32.totalorder (!%p3677_p7), %s3151_s2, 0 }
  0xa1   : > { %2542 = dma.hbm_to_vmem [thread:$0]  (!%p3676_p1), %s3227_s6, 16, %s529_s20, %s3130_s13  }
  0xa2   : > { %551 = sbr.rel (%p3677_p7) target bundleno = 3230 (0xc9e), region = 72 }
  0xa9   : > { %2898 = dma.done.wait (%p3678_p10), [#allocation4], 256   ;;  %p3679_p11 = pmov %p3678_p10 }
  0xaa   : > { %s557_s21 = sand.u32 1, %s3151_s2   ;;  %s3256_s10 = sand.u32 1, %s2919_s26  }
  0xab   : > { %2900 = vsyncadd (%p3679_p11), [#allocation4], 4294967040  ;;  %s558_s16 = scalar_lea.sflag [#allocation7], %s557_s21  ;;  %p3680_p5 = scmp.ne.s32.totalorder %s3671_s11, 0 }
  0xad   : > { %2902 = dma.done.wait (%p3680_p5), %s558_s16, 32  }
  0xae   : > { %2904 = vsyncadd (%p3680_p5), %s558_s16, 4294967264  ;;  %s574_s12 = scalar_lea.sflag [#allocation10], %s557_s21 }
  0xaf   : > { %2906 = dma.done.wait (%p3680_p5), %s574_s12, 32  }
  0xb0   : > { %2908 = vsyncadd (%p3680_p5), %s574_s12, 4294967264  ;;  %p660_p3 = scmp.lt.s32.totalorder %s2927_s28, 1  ;;  %s3681_s22 = sld [smem:[#allocation24_spill]] }
  0xb1   : > { %s3682_s6 = sld [smem:[#allocation25_spill]]  ;;  %s3683_s15 = sld [smem:[#allocation26_spill]] }
  0xb2   : > { %s3271_s30 = scalar_select %p660_p3, %s2927_s28, 1 }
  0xb3   : > { %s584_s7 = scalar_lea.vmem [#allocation11], %s3256_s10  ;;  %p2284_p4 = scmp.ne.s32.totalorder %s2927_s28, 0 }
  0xb4   : > { %s662_s20 = scalar_lea.vmem %s3626_s1, %s3271_s30  ;;  %s2328_s23 = sshll.u32 %s3271_s30, 4  ;;  %v692_v0 = vld [vmem:[#allocation3] sm:$0xff] (!%p2284_p4)  ;;  %vm694_vm0 = vcmask (!%p2284_p4), 261120   ;;  %v693_v1 = vld [vmem:[#allocation3 + $0x8] sm:$0xff] (!%p2284_p4) }
  0xb5   : > { %s3281_s11 = scalar_lea.vmem %s3628_s3, %s2328_s23  ;;  %s3286_s24 = scalar_lea.vmem %s3629_s4, %s2328_s23  ;;  %695 = vst.msk [vmem:[#allocation2] sm:$0xff] (!%p2284_p4), %vm694_vm0, %v692_v0  ;;  %696 = vst.msk [vmem:[#allocation2 + $0x8] sm:$0xff] (!%p2284_p4), %vm694_vm0, %v693_v1 }
  0xb6   : > { %s3291_s25 = scalar_lea.vmem %s3681_s22, %s2328_s23  ;;  %s2331_s21 = sshll.u32 %s3271_s30, 5 }
  0xb7   : > { %s3297_s17 = scalar_lea.vmem %s3682_s6, %s2331_s21  ;;  %s685_s13 = scalar_lea.vmem %s3683_s15, %s3271_s30 }
  0xb8   : > { %691 = sbr.rel (%p2284_p4) target bundleno = 191 (0xbf), region = 96 }
  0xbf PF: > { %v3305_v2 = vld [vmem:[#allocation2] sm:$0xff]  ;;  %vm701_vm1 = vcmask 261120   ;;  %v3307_v3 = vld [vmem:[#allocation2 + $0x8] sm:$0xff]  ;;  %v2944_v17 = vmov 0.0   ;;  %vm2945_vm2 = vmmov 0   ;;  %s2947_s14 = smov 120  }
  0xc0   : > { %v702_v4 = vsel %vm701_vm1, %v3305_v2, 0.0  ;;  %v705_v5 = vsel %vm701_vm1, %v3307_v3, 0.0  ;;  %v2641_v16 = vld [vmem:[%s3281_s11] sm:$0xff]   ;;  %2378 = vmatprep.subr.bf16.mxu0 %v2944_v17  ;;  %2386 = vmatprep.subr.bf16.mxu1 %v2944_v17  ;;  %v2642_v18 = vld [vmem:[%s3281_s11 + $0x8] sm:$0xff]   ;;  %s3684_s11 = scalar_lea.vmem [#allocation6], %s3256_s10  ;;  %s2948_s29 = smov 104  }
  0xc1   : > { %703 = vadd.xlane.f32.xlu0 %v702_v4  ;;  %2379 = vmatpush3.bf16.msra.mxu0 %v2641_v16  ;;  %v2285_v27 = vld [vmem:[%s662_s20] ss:$0 sm:$0xff]  ;;  %s2946_s20 = smov 112   ;;  %s2949_s18 = smov 96   ;;  %vm837_vm3 = vcmask 64512   ;;  %vm1328_vm4 = vcmask 1043456  }
  0xc2   : > { %2382 = vmatprep.mubr.msk.bf16.mxu0 %vm2945_vm2, %v2944_v17  ;;  %2380 = vmatprep.subr.bf16.mxu0 %v2944_v17  ;;  %v2286_v31 = vld [vmem:[%s3684_s11] ss:$0 sm:$0xff]  ;;  %s2950_s19 = smov 64   ;;  %s2951_s22 = smov 8   ;;  %vm1734_vm5 = vcmask 130048   ;;  %vm1737_vm6 = vcmask 195584  }
  0xc3   : > { %2388 = vmatprep.mubr.msk.bf16.mxu1 %vm2945_vm2, %v2944_v17  ;;  %s2952_s21 = smov 16   ;;  %s2953_s16 = smov 24   ;;  %vm1963_vm7 = vcmask 523264  }
  0xc4   : > { %p2321_p9 = scmp.ne.s32.totalorder %s2927_s28, 1 }
  0xc5   : > { %706 = vadd.xlane.f32.xlu0 %v705_v5  ;;  %2381 = vmatpush3.bf16.msra.mxu0 %v2642_v18  ;;  %s3688_s30 = sld [smem:[#allocation27_spill]] (!%p2321_p9)  ;;  %s3689_s27 = sld [smem:[#allocation28_spill]] (!%p2321_p9) }
  0xc6   : > { %2392 = vmatprep.subr.bf16.mxu0 %v2944_v17 }
 0x14e   : > { %v704_v6 = vpop.xlane.xlu0 %703 }
 0x14f   : > { %v709_v7 = vmul.f32 0.03125, %v704_v6 }
 0x151   : > { %v711_v8 = vsub.f32 %v3305_v2, %v709_v7 }
 0x152   : > { %v707_v9 = vpop.xlane.xlu0 %706 }
 0x153   : > { %v710_v10 = vmul.f32 0.03125, %v707_v9  ;;  %v713_v11 = vmul.f32 %v711_v8, %v711_v8 }
 0x155   : > { %v712_v12 = vsub.f32 %v3307_v3, %v710_v10  ;;  %v715_v13 = vsel %vm701_vm1, %v713_v11, 0.0 }
 0x156   : > { %716 = vadd.xlane.f32.xlu1 %v715_v13 }
 0x157   : > { %v714_v14 = vmul.f32 %v712_v12, %v712_v12 }
 0x159   : > { %v718_v15 = vsel %vm701_vm1, %v714_v14, 0.0 }
 0x15a   : > { %719 = vadd.xlane.f32.xlu1 %v718_v15 }
 0x1e3   : > { %v717_v19 = vpop.xlane.xlu1 %716 }
 0x1e4   : > { %v721_v20 = vmul.f32 0.03125, %v717_v19 }
 0x1e6   : > { %v723_v21 = vadd.f32 1e-05, %v721_v20 }
 0x1e7   : > { %v720_v22 = vpop.xlane.xlu1 %719 }
 0x1e8   : > { %2651 = vrsqrt.f32 %v723_v21  ;;  %v722_v23 = vmul.f32 0.03125, %v720_v22 }
 0x1ea   : > { %v724_v24 = vadd.f32 1e-05, %v722_v23 }
 0x1ec   : > { %2653 = vrsqrt.f32 %v724_v24 }
 0x1f2   : > { %v2652_v25 = vpop.eup %2651 }
 0x1f3   : > { %v727_v26 = vmul.f32 %v2652_v25, %v711_v8 }
 0x1f5   : > { %v735_v30 = vmul.f32 %v2285_v27, %v727_v26 }
 0x1f6   : > { %v2654_v28 = vpop.eup %2653 }
 0x1f7   : > { %v728_v29 = vmul.f32 %v2654_v28, %v712_v12  ;;  %v743_v33 = vadd.f32 %v2286_v31, %v735_v30 }
 0x1f9   : > { %v736_v32 = vmul.f32 %v2285_v27, %v728_v29 }
 0x1fb   : > { %v744_v34 = vadd.f32 %v2286_v31, %v736_v32 }
 0x1fd   : > { %v745_v35 = vpack.c.bf16 %v744_v34, %v743_v33 }
 0x1ff   : > { %2383 = vmatmul.mubr.msk.bf16.vlgmr.msra.gmra.mrb[0].mxu0 %vm701_vm1, %v745_v35 }
 0x200   : > { %2394 = vmatprep.mubr.msk.bf16.mxu0 %vm2945_vm2, %v2944_v17 }
 0x2d2   : > { %v799_v36 = vpop.f32.mrb[0].mxu0 }
 0x2d3   : > { %v2384_v37 = vpop.f32.mrb[1].mxu0  ;;  %v826_v42 = vpack.c.bf16 %v799_v36, %v799_v36 }
 0x2d4   : > { %v802_v38 = vpop.f32.mrb[2].mxu0 }
 0x2d5   : > { %v2385_v39 = vpop.f32.mrb[3].mxu0  ;;  %v2616_v40 = vpack.i.bf16 %v802_v38, %v799_v36  ;;  %v3337_v41 = vpack.c.bf16 %v802_v38, %v802_v38 }
 0x2d7   : > { %2617 = vrot.lane.b32.xlu1 %v2616_v40, %s2946_s20  ;;  %2612 = vrot.lane.b32.xlu0 %v2616_v40, %s2947_s14 }
 0x2db   : > { %2622 = vrot.lane.b32.xlu1 %v2616_v40, %s2948_s29  ;;  %885 = vrot.lane.b32.xlu0 %v3337_v41, %s2949_s18 }
 0x2df   : > { %835 = vrot.lane.b32.xlu1 %v826_v42, %s2949_s18 }
 0x349   : > { %v2618_v43 = vpop.permute.xlu1 %2617  ;;  %v2613_v44 = vpop.permute.xlu0 %2612 }
 0x34a   : > { %v2615_v45 = vunpack.i.h.bf16 %v2613_v44  ;;  %v2614_v46 = vunpack.i.l.bf16 %v2613_v44  ;;  %v2620_v47 = vunpack.i.h.bf16 %v2618_v43  ;;  %v2619_v48 = vunpack.i.l.bf16 %v2618_v43 }
 0x34c   : > { %v3342_v49 = vpack.c.bf16 %v2615_v45, %v2615_v45  ;;  %v3344_v50 = vpack.c.bf16 %v2614_v46, %v2614_v46  ;;  %v3351_v54 = vpack.c.bf16 %v2620_v47, %v2620_v47  ;;  %v3353_v55 = vpack.c.bf16 %v2619_v48, %v2619_v48 }
 0x34d   : > { %v2623_v51 = vpop.permute.xlu1 %2622  ;;  %v886_v52 = vpop.permute.xlu0 %885 }
 0x34e   : > { %v891_v53 = vsel %vm837_vm3, %v886_v52, 0  ;;  %934 = vrot.lane.b32.xlu1 %v3344_v50, %s2949_s18  ;;  %983 = vrot.lane.b32.xlu0 %v3342_v49, %s2949_s18  ;;  %v2625_v56 = vunpack.i.h.bf16 %v2623_v51  ;;  %v2624_v57 = vunpack.i.l.bf16 %v2623_v51 }
 0x34f   : > { %2393 = vmatpush3.bf16.xpose.msra.mxu0 %v891_v53 }
 0x350   : > { %2404 = vmatprep.subr.bf16.mxu0 %v2944_v17  ;;  %v3361_v60 = vpack.c.bf16 %v2625_v56, %v2625_v56  ;;  %v3363_v61 = vpack.c.bf16 %v2624_v57, %v2624_v57 }
 0x351   : > { %v836_v58 = vpop.permute.xlu1 %835 }
 0x352   : > { %1032 = vrot.lane.b32.xlu1 %v3353_v55, %s2949_s18  ;;  %1081 = vrot.lane.b32.xlu0 %v3351_v54, %s2949_s18  ;;  %v842_v59 = vsel %vm837_vm3, %v836_v58, 0 }
 0x353   : > { %2387 = vmatpush3.bf16.xpose.msra.mxu1 %v842_v59 }
 0x354   : > { %2398 = vmatprep.subr.bf16.mxu1 %v2944_v17 }
 0x356   : > { %1130 = vrot.lane.b32.xlu1 %v3363_v61, %s2949_s18  ;;  %1179 = vrot.lane.b32.xlu0 %v3361_v60, %s2949_s18 }
 0x357   : > { %2395 = vmatmul.mubr.msk.bf16.vlgmr.msra.gmra.mrb[4].mxu0 %vm837_vm3, %v3337_v41 }
 0x358   : > { %2406 = vmatprep.mubr.msk.bf16.mxu0 %vm2945_vm2, %v2944_v17 }
 0x35a   : > { %2389 = vmatmul.mubr.msk.bf16.vlgmr.msra.gmra.mrb[0].mxu1 %vm837_vm3, %v826_v42  ;;  %1323 = vrot.lane.b32.xlu1 %v826_v42, %s2950_s19 }
 0x35b   : > { %2400 = vmatprep.mubr.msk.bf16.mxu1 %vm2945_vm2, %v2944_v17 }
 0x3c0   : > { %v935_v62 = vpop.permute.xlu1 %934  ;;  %v984_v63 = vpop.permute.xlu0 %983 }
 0x3c1   : > { %v940_v0 = vsel %vm837_vm3, %v935_v62, 0  ;;  %v989_v1 = vsel %vm837_vm3, %v984_v63, 0 }
 0x3c2   : > { %2399 = vmatpush3.bf16.xpose.msra.mxu1 %v940_v0  ;;  %2405 = vmatpush3.bf16.xpose.msra.mxu0 %v989_v1 }
 0x3c3   : > { %2410 = vmatprep.subr.bf16.mxu1 %v2944_v17  ;;  %2416 = vmatprep.subr.bf16.mxu0 %v2944_v17 }
 0x3c4   : > { %v1033_v4 = vpop.permute.xlu1 %1032  ;;  %v1082_v5 = vpop.permute.xlu0 %1081 }
 0x3c5   : > { %v1038_v6 = vsel %vm837_vm3, %v1033_v4, 0  ;;  %v1087_v7 = vsel %vm837_vm3, %v1082_v5, 0 }
 0x3c8   : > { %v1131_v8 = vpop.permute.xlu1 %1130  ;;  %v1180_v9 = vpop.permute.xlu0 %1179 }
 0x3c9   : > { %2401 = vmatmul.mubr.msk.bf16.vlgmr.msra.gmra.mrb[4].mxu1 %vm837_vm3, %v3344_v50  ;;  %2407 = vmatmul.mubr.msk.bf16.vlgmr.msra.gmra.mrb[8].mxu0 %vm837_vm3, %v3342_v49  ;;  %v1136_v10 = vsel %vm837_vm3, %v1131_v8, 0  ;;  %v1185_v11 = vsel %vm837_vm3, %v1180_v9, 0 }
 0x3ca   : > { %2411 = vmatpush3.bf16.xpose.msra.mxu1 %v1038_v6  ;;  %2417 = vmatpush3.bf16.xpose.msra.mxu0 %v1087_v7 }
 0x3cb   : > { %2412 = vmatprep.mubr.msk.bf16.mxu1 %vm2945_vm2, %v2944_v17  ;;  %2418 = vmatprep.mubr.msk.bf16.mxu0 %vm2945_vm2, %v2944_v17 }
 0x3cc   : > { %2422 = vmatprep.subr.bf16.mxu1 %v2944_v17  ;;  %2428 = vmatprep.subr.bf16.mxu0 %v2944_v17  ;;  %v1324_v12 = vpop.permute.xlu1 %1323 }
 0x3cd   : > { %v1330_v13 = vsel %vm1328_vm4, %v1324_v12, 0 }
 0x3d1   : > { %2413 = vmatmul.mubr.msk.bf16.vlgmr.msra.gmra.mrb[8].mxu1 %vm837_vm3, %v3353_v55  ;;  %2419 = vmatmul.mubr.msk.bf16.vlgmr.msra.gmra.mrb[12].mxu0 %vm837_vm3, %v3351_v54 }
 0x3d2   : > { %2423 = vmatpush3.bf16.xpose.msra.mxu1 %v1136_v10  ;;  %2429 = vmatpush3.bf16.xpose.msra.mxu0 %v1185_v11 }
 0x3d3   : > { %2424 = vmatprep.mubr.msk.bf16.mxu1 %vm2945_vm2, %v2944_v17  ;;  %2430 = vmatprep.mubr.msk.bf16.mxu0 %vm2945_vm2, %v2944_v17 }
 0x3d4   : > { %2434 = vmatprep.subr.bf16.mxu1 %v2944_v17  ;;  %2440 = vmatprep.subr.bf16.mxu0 %v2944_v17 }
 0x3d9   : > { %2425 = vmatmul.mubr.msk.bf16.vlgmr.msra.gmra.mrb[12].mxu1 %vm837_vm3, %v3363_v61  ;;  %2431 = vmatmul.mubr.msk.bf16.vlgmr.msra.gmra.mrb[16].mxu0 %vm837_vm3, %v3361_v60 }
 0x3da   : > { %2435 = vmatpush3.bf16.msra.mxu1 %v1330_v13  ;;  %2442 = vmatprep.mubr.msk.bf16.mxu0 %vm2945_vm2, %v2944_v17 }
 0x3db   : > { %2436 = vmatprep.mubr.msk.bf16.mxu1 %vm2945_vm2, %v2944_v17  ;;  %2446 = vmatprep.subr.bf16.mxu1 %v2944_v17 }
 0x42a   : > { %v927_v14 = vpop.f32.mrb[4].mxu0 }
 0x42b   : > { %v2396_v15 = vpop.f32.mrb[5].mxu0  ;;  %v1230_v16 = vsel %vm837_vm3, %v927_v14, -inf }
 0x42c   : > { %1231 = vmax.xlane.f32.xlu0 %v1230_v16  ;;  %v930_v18 = vpop.f32.mrb[6].mxu0 }
 0x42d   : > { %v2397_v19 = vpop.f32.mrb[7].mxu0  ;;  %v878_v20 = vpop.f32.mrb[0].mxu1 }
 0x42e   : > { %v2390_v21 = vpop.f32.mrb[1].mxu1  ;;  %v1227_v22 = vsel %vm837_vm3, %v878_v20, -inf }
 0x42f   : > { %v881_v23 = vpop.f32.mrb[2].mxu1  ;;  %1228 = vmax.xlane.f32.xlu1 %v1227_v22 }
 0x430   : > { %v2391_v24 = vpop.f32.mrb[3].mxu1 }
 0x49c   : > { %v976_v25 = vpop.f32.mrb[4].mxu1  ;;  %v1025_v26 = vpop.f32.mrb[8].mxu0 }
 0x49d   : > { %v2402_v27 = vpop.f32.mrb[5].mxu1  ;;  %v2408_v28 = vpop.f32.mrb[9].mxu0  ;;  %v1233_v29 = vsel %vm837_vm3, %v976_v25, -inf  ;;  %v1236_v34 = vsel %vm837_vm3, %v1025_v26, -inf }
 0x49e   : > { %v979_v30 = vpop.f32.mrb[6].mxu1  ;;  %1234 = vmax.xlane.f32.xlu0 %v1233_v29  ;;  %v1028_v31 = vpop.f32.mrb[10].mxu0 }
 0x49f   : > { %v2403_v32 = vpop.f32.mrb[7].mxu1  ;;  %v2409_v33 = vpop.f32.mrb[11].mxu0 }
 0x4a2   : > { %1237 = vmax.xlane.f32.xlu0 %v1236_v34 }
 0x4a4   : > { %v1074_v35 = vpop.f32.mrb[8].mxu1  ;;  %v3420_v36 = vpop.f32.mrb[12].mxu0 }
 0x4a5   : > { %v2414_v37 = vpop.f32.mrb[9].mxu1  ;;  %v2420_v38 = vpop.f32.mrb[13].mxu0  ;;  %v1239_v39 = vsel %vm837_vm3, %v1074_v35, -inf  ;;  %v1242_v40 = vsel %vm837_vm3, %v3420_v36, -inf }
 0x4a6   : > { %1240 = vmax.xlane.f32.xlu1 %v1239_v39  ;;  %v1077_v42 = vpop.f32.mrb[10].mxu1  ;;  %1243 = vmax.xlane.f32.xlu0 %v1242_v40  ;;  %v1126_v43 = vpop.f32.mrb[14].mxu0 }
 0x4a7   : > { %v2415_v44 = vpop.f32.mrb[11].mxu1  ;;  %v2421_v45 = vpop.f32.mrb[15].mxu0 }
 0x4ac   : > { %v1172_v46 = vpop.f32.mrb[12].mxu1  ;;  %v3425_v47 = vpop.f32.mrb[16].mxu0 }
 0x4ad   : > { %v2426_v48 = vpop.f32.mrb[13].mxu1  ;;  %v2432_v51 = vpop.f32.mrb[17].mxu0  ;;  %v1245_v52 = vsel %vm837_vm3, %v1172_v46, -inf  ;;  %v1248_v53 = vsel %vm837_vm3, %v3425_v47, -inf }
 0x4ae   : > { %1246 = vmax.xlane.f32.xlu1 %v1245_v52  ;;  %v1175_v56 = vpop.f32.mrb[14].mxu1  ;;  %1249 = vmax.xlane.f32.xlu0 %v1248_v53  ;;  %v1224_v57 = vpop.f32.mrb[18].mxu0 }
 0x4af   : > { %v2427_v58 = vpop.f32.mrb[15].mxu1  ;;  %v2433_v59 = vpop.f32.mrb[19].mxu0 }
 0x4b9   : > { %v1232_v62 = vpop.xlane.xlu0 %1231 }
 0x4ba   : > { %v1252_v63 = vsub.f32 %v927_v14, %v1232_v62 }
 0x4bc   : > { %v1229_v0 = vpop.xlane.xlu1 %1228  ;;  %v1261_v1 = vmul.f32 1.442695, %v1252_v63 }
 0x4bd   : > { %v1251_v4 = vsub.f32 %v878_v20, %v1229_v0 }
 0x4be   : > { %2655 = vpow2.f32 %v1261_v1 }
 0x4bf   : > { %1420 = vrot.lane.b32.xlu1 %v3344_v50, %s2950_s19  ;;  %v1259_v5 = vmul.f32 1.442695, %v1251_v4 }
 0x4c1   : > { %2657 = vpow2.f32 %v1259_v5 }
 0x4c3   : > { %1468 = vrot.lane.b32.xlu1 %v3342_v49, %s2950_s19 }
 0x4c4   : > { %1372 = vrot.lane.b32.xlu0 %v3337_v41, %s2950_s19 }
 0x4c8   : > { %v2656_v6 = vpop.eup %2655 }
 0x4c9   : > { %v1278_v7 = vsel %vm837_vm3, %v2656_v6, 0.0 }
 0x4cb   : > { %v3437_v8 = vpop.eup %2657 }
 0x4cc   : > { %v1275_v49 = vsel %vm837_vm3, %v3437_v8, 0.0 }
 0x4e3   : > { %1279 = vadd.xlane.f32.xlu0 %v1278_v7 }
 0x4e7   : > { %1276 = vadd.xlane.f32.xlu1 %v1275_v49 }
 0x4f8   : > { %1516 = vrot.lane.b32.xlu1 %v3353_v55, %s2950_s19 }
 0x52b   : > { %v1235_v41 = vpop.xlane.xlu0 %1234 }
 0x52c   : > { %v1253_v50 = vsub.f32 %v976_v25, %v1235_v41 }
 0x52e   : > { %v1263_v9 = vmul.f32 1.442695, %v1253_v50 }
 0x52f   : > { %v1238_v10 = vpop.xlane.xlu0 %1237 }
 0x530   : > { %2659 = vpow2.f32 %v1263_v9  ;;  %v1254_v11 = vsub.f32 %v1025_v26, %v1238_v10 }
 0x532   : > { %v1265_v12 = vmul.f32 1.442695, %v1254_v11 }
 0x533   : > { %v1241_v13 = vpop.xlane.xlu1 %1240  ;;  %v1244_v16 = vpop.xlane.xlu0 %1243 }
 0x534   : > { %2661 = vpow2.f32 %v1265_v12  ;;  %v1255_v14 = vsub.f32 %v1074_v35, %v1241_v13  ;;  %v1256_v31 = vsub.f32 %v3420_v36, %v1244_v16 }
 0x536   : > { %v1267_v15 = vmul.f32 1.442695, %v1255_v14  ;;  %v1269_v32 = vmul.f32 1.442695, %v1256_v31 }
 0x538   : > { %2663 = vpow2.f32 %v1267_v15 }
 0x53a   : > { %v3443_v18 = vpop.eup %2659 }
 0x53b   : > { %v1247_v19 = vpop.xlane.xlu1 %1246  ;;  %v1250_v20 = vpop.xlane.xlu0 %1249  ;;  %v1281_v55 = vsel %vm837_vm3, %v3443_v18, 0.0 }
 0x53c   : > { %v1257_v21 = vsub.f32 %v1172_v46, %v1247_v19  ;;  %1282 = vadd.xlane.f32.xlu1 %v1281_v55  ;;  %v1258_v33 = vsub.f32 %v3425_v47, %v1250_v20 }
 0x53e   : > { %v3447_v22 = vpop.eup %2661  ;;  %v1271_v23 = vmul.f32 1.442695, %v1257_v21  ;;  %v1273_v34 = vmul.f32 1.442695, %v1258_v33 }
 0x53f   : > { %v1373_v24 = vpop.permute.xlu0 %1372  ;;  %v1284_v25 = vsel %vm837_vm3, %v3447_v22, 0.0  ;;  %v1421_v35 = vpop.permute.xlu1 %1420 }
 0x540   : > { %2665 = vpow2.f32 %v1271_v23  ;;  %v1378_v26 = vsel %vm1328_vm4, %v1373_v24, 0  ;;  %1285 = vadd.xlane.f32.xlu0 %v1284_v25  ;;  %v1426_v51 = vsel %vm1328_vm4, %v1421_v35, 0 }
 0x541   : > { %2441 = vmatpush3.bf16.msra.mxu0 %v1378_v26  ;;  %2667 = vpow2.f32 %v1269_v32 }
 0x542   : > { %v3452_v27 = vpop.eup %2663  ;;  %2452 = vmatprep.subr.bf16.mxu0 %v2944_v17  ;;  %2669 = vpow2.f32 %v1273_v34 }
 0x543   : > { %v1287_v28 = vsel %vm837_vm3, %v3452_v27, 0.0  ;;  %v1469_v37 = vpop.permute.xlu1 %1468 }
 0x544   : > { %1288 = vadd.xlane.f32.xlu1 %v1287_v28  ;;  %v1474_v46 = vsel %vm1328_vm4, %v1469_v37, 0 }
 0x54a   : > { %v3457_v29 = vpop.eup %2665 }
 0x54b   : > { %v1293_v30 = vsel %vm837_vm3, %v3457_v29, 0.0  ;;  %v3467_v39 = vpop.eup %2667 }
 0x54c   : > { %1294 = vadd.xlane.f32.xlu1 %v1293_v30  ;;  %v3471_v42 = vpop.eup %2669 }
 0x556   : > { %1564 = vrot.lane.b32.xlu0 %v3351_v54, %s2950_s19  ;;  %v1290_v54 = vsel %vm837_vm3, %v3467_v39, 0.0 }
 0x55d   : > { %1612 = vrot.lane.b32.xlu1 %v3363_v61, %s2950_s19  ;;  %v1296_v61 = vsel %vm837_vm3, %v3471_v42, 0.0 }
 0x570   : > { %v1280_v38 = vpop.xlane.xlu0 %1279 }
 0x571   : > { %2671 = vrcp.f32 %v1280_v38 }
 0x574   : > { %v1277_v40 = vpop.xlane.xlu1 %1276 }
 0x575   : > { %2673 = vrcp.f32 %v1277_v40  ;;  %1291 = vadd.xlane.f32.xlu0 %v1290_v54 }
 0x578   : > { %v1517_v52 = vpop.permute.xlu1 %1516 }
 0x579   : > { %1297 = vadd.xlane.f32.xlu0 %v1296_v61  ;;  %v1522_v0 = vsel %vm1328_vm4, %v1517_v52, 0 }
 0x57b   : > { %v2672_v36 = vpop.eup %2671 }
 0x57c   : > { %v1308_v43 = vmul.f32 %v2672_v36, %v2656_v6 }
 0x57e   : > { %v1316_v44 = vpack.c.bf16 %v1308_v43, %v1308_v43 }
 0x57f   : > { %v2674_v45 = vpop.eup %2673 }
 0x580   : > { %v1307_v47 = vmul.f32 %v2674_v45, %v3437_v8  ;;  %2443 = vmatmul.mubr.msk.bf16.vlgmr.msra.gmra.mrb[20].mxu0 %vm837_vm3, %v1316_v44 }
 0x581   : > { %2453 = vmatpush3.bf16.msra.mxu0 %v1474_v46  ;;  %2454 = vmatprep.mubr.msk.bf16.mxu0 %vm2945_vm2, %v2944_v17  ;;  %v2643_v46 = vld [vmem:[%s3286_s24] sm:$0xff]  }
 0x582   : > { %v1315_v48 = vpack.c.bf16 %v1307_v47, %v1307_v47  ;;  %2464 = vmatprep.subr.bf16.mxu0 %v2944_v17  ;;  %v2644_v47 = vld [vmem:[%s3286_s24 + $0x8] sm:$0xff]   ;;  %s3685_s24 = scalar_lea.vmem [#allocation8], %s3256_s10 }
 0x584   : > { %2437 = vmatmul.mubr.msk.bf16.vlgmr.msra.gmra.mrb[16].mxu1 %vm837_vm3, %v1315_v48 }
 0x585   : > { %2447 = vmatpush3.bf16.msra.mxu1 %v1426_v51  ;;  %2448 = vmatprep.mubr.msk.bf16.mxu1 %vm2945_vm2, %v2944_v17 }
 0x586   : > { %2458 = vmatprep.subr.bf16.mxu1 %v2944_v17 }
 0x58f   : > { %1660 = vrot.lane.b32.xlu0 %v3361_v60, %s2950_s19 }
 0x5c9   : > { %v1283_v53 = vpop.xlane.xlu1 %1282 }
 0x5ca   : > { %2675 = vrcp.f32 %v1283_v53 }
 0x5cd   : > { %v1286_v56 = vpop.xlane.xlu0 %1285 }
 0x5ce   : > { %2677 = vrcp.f32 %v1286_v56 }
 0x5d1   : > { %v1289_v57 = vpop.xlane.xlu1 %1288  ;;  %v1565_v60 = vpop.permute.xlu0 %1564 }
 0x5d2   : > { %2679 = vrcp.f32 %v1289_v57  ;;  %v1570_v8 = vsel %vm1328_vm4, %v1565_v60, 0 }
 0x5d4   : > { %v2676_v58 = vpop.eup %2675 }
 0x5d5   : > { %v1309_v59 = vmul.f32 %v2676_v58, %v3443_v18 }
 0x5d7   : > { %v1317_v62 = vpack.c.bf16 %v1309_v59, %v1309_v59 }
 0x5d8   : > { %v2678_v63 = vpop.eup %2677 }
 0x5d9   : > { %v1310_v1 = vmul.f32 %v2678_v63, %v3447_v22  ;;  %2449 = vmatmul.mubr.msk.bf16.vlgmr.msra.gmra.mrb[20].mxu1 %vm837_vm3, %v1317_v62  ;;  %v1295_v4 = vpop.xlane.xlu1 %1294 }
 0x5da   : > { %2459 = vmatpush3.bf16.msra.mxu1 %v1522_v0  ;;  %2681 = vrcp.f32 %v1295_v4  ;;  %2460 = vmatprep.mubr.msk.bf16.mxu1 %vm2945_vm2, %v2944_v17 }
 0x5db   : > { %v1318_v5 = vpack.c.bf16 %v1310_v1, %v1310_v1  ;;  %2470 = vmatprep.subr.bf16.mxu1 %v2944_v17 }
 0x5dc   : > { %v2680_v6 = vpop.eup %2679 }
 0x5dd   : > { %v1311_v7 = vmul.f32 %v2680_v6, %v3452_v27  ;;  %2455 = vmatmul.mubr.msk.bf16.vlgmr.msra.gmra.mrb[24].mxu0 %vm837_vm3, %v1318_v5  ;;  %v1613_v49 = vpop.permute.xlu1 %1612 }
 0x5de   : > { %2465 = vmatpush3.bf16.msra.mxu0 %v1570_v8  ;;  %2466 = vmatprep.mubr.msk.bf16.mxu0 %vm2945_vm2, %v2944_v17  ;;  %v1618_v50 = vsel %vm1328_vm4, %v1613_v49, 0 }
 0x5df   : > { %v1319_v41 = vpack.c.bf16 %v1311_v7, %v1311_v7  ;;  %2476 = vmatprep.subr.bf16.mxu0 %v2944_v17 }
 0x5e1   : > { %2461 = vmatmul.mubr.msk.bf16.vlgmr.msra.gmra.mrb[24].mxu1 %vm837_vm3, %v1319_v41 }
 0x5e2   : > { %2471 = vmatpush3.bf16.msra.mxu1 %v1618_v50  ;;  %2472 = vmatprep.mubr.msk.bf16.mxu1 %vm2945_vm2, %v2944_v17 }
 0x5e3   : > { %2482 = vmatprep.subr.bf16.mxu1 %v2944_v17 }
 0x5e4   : > { %v2682_v9 = vpop.eup %2681 }
 0x5e5   : > { %v1313_v10 = vmul.f32 %v2682_v9, %v3457_v29 }
 0x5e7   : > { %v1321_v11 = vpack.c.bf16 %v1313_v10, %v1313_v10 }
 0x5e9   : > { %2473 = vmatmul.mubr.msk.bf16.vlgmr.msra.gmra.mrb[28].mxu1 %vm837_vm3, %v1321_v11 }
 0x5ea   : > { %2486 = vmatprep.mubr.msk.bf16.mxu1 %vm2945_vm2, %v2944_v17  ;;  %2483 = vmatpush3.bf16.msra.mxu1 %v2643_v46 }
 0x5eb   : > { %2484 = vmatprep.subr.bf16.mxu1 %v2944_v17 }
 0x5ee   : > { %2485 = vmatpush3.bf16.msra.mxu1 %v2644_v47 }
 0x5ef   : > { %2498 = vmatprep.subr.bf16.mxu1 %v2944_v17 }
 0x602   : > { %v1292_v12 = vpop.xlane.xlu0 %1291 }
 0x603   : > { %2683 = vrcp.f32 %v1292_v12 }
 0x606   : > { %v1298_v13 = vpop.xlane.xlu0 %1297 }
 0x607   : > { %2685 = vrcp.f32 %v1298_v13 }
 0x60a   : > { %v1661_v16 = vpop.permute.xlu0 %1660 }
 0x60b   : > { %v1666_v20 = vsel %vm1328_vm4, %v1661_v16, 0 }
 0x60d   : > { %v2684_v14 = vpop.eup %2683 }
 0x60e   : > { %v1312_v15 = vmul.f32 %v2684_v14, %v3467_v39 }
 0x610   : > { %v1320_v18 = vpack.c.bf16 %v1312_v15, %v1312_v15 }
 0x611   : > { %v2686_v19 = vpop.eup %2685 }
 0x612   : > { %2467 = vmatmul.mubr.msk.bf16.vlgmr.msra.gmra.mrb[28].mxu0 %vm837_vm3, %v1320_v18  ;;  %v1314_v55 = vmul.f32 %v2686_v19, %v3471_v42 }
 0x613   : > { %2477 = vmatpush3.bf16.msra.mxu0 %v1666_v20  ;;  %2478 = vmatprep.mubr.msk.bf16.mxu0 %vm2945_vm2, %v2944_v17 }
 0x614   : > { %2490 = vmatprep.subr.bf16.mxu0 %v2944_v17  ;;  %v1322_v21 = vpack.c.bf16 %v1314_v55, %v1314_v55 }
 0x61a   : > { %2479 = vmatmul.mubr.msk.bf16.vlgmr.msra.gmra.mrb[32].mxu0 %vm837_vm3, %v1322_v21 }
 0x61b   : > { %2494 = vmatprep.mubr.msk.bf16.mxu0 %vm2945_vm2, %v2944_v17 }
 0x653   : > { %v1414_v22 = vpop.f32.mrb[20].mxu0 }
 0x654   : > { %v2444_v23 = vpop.f32.mrb[21].mxu0 }
 0x655   : > { %v1417_v24 = vpop.f32.mrb[22].mxu0 }
 0x656   : > { %v2445_v25 = vpop.f32.mrb[23].mxu0 }
 0x657   : > { %v1366_v26 = vpop.f32.mrb[16].mxu1 }
 0x658   : > { %v2438_v27 = vpop.f32.mrb[17].mxu1 }
 0x659   : > { %v1369_v28 = vpop.f32.mrb[18].mxu1 }
 0x65a   : > { %v2439_v29 = vpop.f32.mrb[19].mxu1 }
 0x6ac   : > { %v1462_v30 = vpop.f32.mrb[20].mxu1 }
 0x6ad   : > { %v2450_v31 = vpop.f32.mrb[21].mxu1 }
 0x6ae   : > { %v1465_v32 = vpop.f32.mrb[22].mxu1  ;;  %v2646_v31 = vld [vmem:[%s3291_s25 + $0x8] sm:$0xff]  }
 0x6af   : > { %v2451_v33 = vpop.f32.mrb[23].mxu1 }
 0x6b0   : > { %v1510_v34 = vpop.f32.mrb[24].mxu0 }
 0x6b1   : > { %v2626_v35 = vpack.i.bf16 %v1510_v34, %v1462_v30  ;;  %v2456_v37 = vpop.f32.mrb[25].mxu0  ;;  %v2645_v30 = vld [vmem:[%s3291_s25] sm:$0xff]   ;;  %s3686_s25 = scalar_lea.vmem [#allocation9], %s3256_s10 }
 0x6b2   : > { %v1513_v38 = vpop.f32.mrb[26].mxu0  ;;  %2491 = vmatpush3.bf16.msra.mxu0 %v2645_v30 }
 0x6b3   : > { %2627 = vrot.lane.b32.xlu1 %v2626_v35, %s2951_s22  ;;  %v2457_v39 = vpop.f32.mrb[27].mxu0  ;;  %2492 = vmatprep.subr.bf16.mxu0 %v2944_v17 }
 0x6b4   : > { %v1558_v40 = vpop.f32.mrb[24].mxu1 }
 0x6b5   : > { %v2462_v54 = vpop.f32.mrb[25].mxu1 }
 0x6b6   : > { %v1561_v42 = vpop.f32.mrb[26].mxu1  ;;  %2493 = vmatpush3.bf16.msra.mxu0 %v2646_v31  ;;  %v2309_v54 = vld [vmem:[%s3685_s24] ss:$0 sm:$0xff] }
 0x6b7   : > { %v2463_v61 = vpop.f32.mrb[27].mxu1 }
 0x6bc   : > { %v1654_v36 = vpop.f32.mrb[28].mxu1 }
 0x6bd   : > { %v2474_v43 = vpop.f32.mrb[29].mxu1 }
 0x6be   : > { %v1657_v44 = vpop.f32.mrb[30].mxu1  ;;  %v2310_v43 = vld [vmem:[%s3686_s25] ss:$0 sm:$0xff] }
 0x6bf   : > { %v2475_v45 = vpop.f32.mrb[31].mxu1 }
 0x6e5   : > { %v1606_v48 = vpop.f32.mrb[28].mxu0 }
 0x6e6   : > { %v2631_v51 = vpack.i.bf16 %v1606_v48, %v1558_v40  ;;  %v2468_v52 = vpop.f32.mrb[29].mxu0  ;;  %v2647_v48 = vld [vmem:[%s3297_s17] sm:$0xff]  }
 0x6e7   : > { %v1609_v53 = vpop.f32.mrb[30].mxu0  ;;  %v2649_v52 = vld [vmem:[%s3297_s17 + $0x10] sm:$0xff]  }
 0x6e8   : > { %2632 = vrot.lane.b32.xlu0 %v2631_v51, %s2952_s21  ;;  %v2469_v56 = vpop.f32.mrb[31].mxu0  ;;  %v2648_v51 = vld [vmem:[%s3297_s17 + $0x8] sm:$0xff]   ;;  %v2650_v53 = vld [vmem:[%s3297_s17 + $0x18] sm:$0xff]  }
 0x6e9   : > { %v2311_v56 = vld [vmem:[%s584_s7] ss:$0 sm:$0xff] }
 0x6ed   : > { %v1702_v57 = vpop.f32.mrb[32].mxu0 }
 0x6ee   : > { %v2636_v58 = vpack.i.bf16 %v1702_v57, %v1654_v36  ;;  %v2480_v59 = vpop.f32.mrb[33].mxu0 }
 0x6ef   : > { %v1705_v62 = vpop.f32.mrb[34].mxu0 }
 0x6f0   : > { %2637 = vrot.lane.b32.xlu1 %v2636_v58, %s2953_s16  ;;  %v2481_v63 = vpop.f32.mrb[35].mxu0 }
 0x725   : > { %v2628_v0 = vpop.permute.xlu1 %2627 }
 0x726   : > { %v2630_v4 = vunpack.i.h.bf16 %v2628_v0  ;;  %v2629_v60 = vunpack.i.l.bf16 %v2628_v0 }
 0x728   : > { %v1733_v8 = vsel %vm837_vm3, %v1414_v22, %v2630_v4  ;;  %v1732_v49 = vsel %vm837_vm3, %v1366_v26, %v2629_v60 }
 0x75a   : > { %v2633_v1 = vpop.permute.xlu0 %2632 }
 0x75b   : > { %v2635_v5 = vunpack.i.h.bf16 %v2633_v1  ;;  %v2634_v6 = vunpack.i.l.bf16 %v2633_v1 }
 0x75d   : > { %v1736_v9 = vsel %vm1734_vm5, %v1733_v8, %v2635_v5  ;;  %v1735_v10 = vsel %vm1734_vm5, %v1732_v49, %v2634_v6 }
 0x762   : > { %v2638_v7 = vpop.permute.xlu1 %2637 }
 0x763   : > { %v2640_v41 = vunpack.i.h.bf16 %v2638_v7  ;;  %v2639_v50 = vunpack.i.l.bf16 %v2638_v7 }
 0x765   : > { %v1739_v11 = vsel %vm1737_vm6, %v1736_v9, %v2640_v41  ;;  %v1738_v12 = vsel %vm1737_vm6, %v1735_v10, %v2639_v50  ;;  %v2315_v9 = vld [vmem:[%s685_s13] ss:$0 sm:$0xff] }
 0x766   : > { %v1740_v13 = vpack.c.bf16 %v1739_v11, %v1738_v12 }
 0x768   : > { %2487 = vmatmul.mubr.msk.bf16.vlgmr.msra.gmra.mrb[32].mxu1 %vm701_vm1, %v1740_v13 }
 0x769   : > { %2506 = vmatprep.mubr.msk.bf16.mxu1 %vm2945_vm2, %v2944_v17  ;;  %2499 = vmatpush3.bf16.msra.mxu1 %v2647_v48 }
 0x76a   : > { %2500 = vmatprep.subr.bf16.mxu1 %v2944_v17 }
 0x76d   : > { %2501 = vmatpush3.bf16.msra.mxu1 %v2648_v51 }
 0x76e   : > { %2502 = vmatprep.subr.bf16.mxu1 %v2944_v17 }
 0x771   : > { %2503 = vmatpush3.bf16.msra.mxu1 %v2649_v52 }
 0x772   : > { %2504 = vmatprep.subr.bf16.mxu1 %v2944_v17 }
 0x775   : > { %2505 = vmatpush3.bf16.msra.mxu1 %v2650_v53 }
 0x83b   : > { %v1794_v14 = vpop.f32.mrb[32].mxu1 }
 0x83c   : > { %v3531_v15 = vadd.f32 %v1794_v14, %v3305_v2  ;;  %v2488_v16 = vpop.f32.mrb[33].mxu1 }
 0x83d   : > { %v1797_v18 = vpop.f32.mrb[34].mxu1 }
 0x83e   : > { %v3534_v19 = vadd.f32 %v1797_v18, %v3307_v3  ;;  %v2489_v20 = vpop.f32.mrb[35].mxu1  ;;  %v1803_v55 = vsel %vm701_vm1, %v3531_v15, 0.0 }
 0x83f   : > { %1804 = vadd.xlane.f32.xlu0 %v1803_v55 }
 0x840   : > { %v1806_v21 = vsel %vm701_vm1, %v3534_v19, 0.0 }
 0x841   : > { %1807 = vadd.xlane.f32.xlu1 %v1806_v21 }
 0x8cc   : > { %v1805_v22 = vpop.xlane.xlu0 %1804 }
 0x8cd   : > { %v1809_v23 = vmul.f32 0.03125, %v1805_v22 }
 0x8ce   : > { %v1808_v2 = vpop.xlane.xlu1 %1807 }
 0x8cf   : > { %v1811_v24 = vsub.f32 %v3531_v15, %v1809_v23  ;;  %v1810_v25 = vmul.f32 0.03125, %v1808_v2 }
 0x8d1   : > { %v1812_v3 = vsub.f32 %v3534_v19, %v1810_v25  ;;  %v1813_v26 = vmul.f32 %v1811_v24, %v1811_v24 }
 0x8d3   : > { %v1815_v27 = vsel %vm701_vm1, %v1813_v26, 0.0  ;;  %v1814_v28 = vmul.f32 %v1812_v3, %v1812_v3 }
 0x8d4   : > { %1816 = vadd.xlane.f32.xlu0 %v1815_v27 }
 0x8d5   : > { %v1818_v29 = vsel %vm701_vm1, %v1814_v28, 0.0 }
 0x8d8   : > { %1819 = vadd.xlane.f32.xlu0 %v1818_v29 }
 0x961   : > { %v1817_v32 = vpop.xlane.xlu0 %1816 }
 0x962   : > { %v1821_v33 = vmul.f32 0.03125, %v1817_v32 }
 0x964   : > { %v1823_v34 = vadd.f32 1e-05, %v1821_v33 }
 0x965   : > { %v1820_v35 = vpop.xlane.xlu0 %1819 }
 0x966   : > { %2687 = vrsqrt.f32 %v1823_v34  ;;  %v1822_v37 = vmul.f32 0.03125, %v1820_v35  ;;  %v2322_v35 = vld [vmem:[%s3688_s30] ss:$0 sm:$0xff] (!%p2321_p9) }
 0x968   : > { %v1824_v38 = vadd.f32 1e-05, %v1822_v37 }
 0x96a   : > { %2689 = vrsqrt.f32 %v1824_v38  ;;  %v2323_v38 = vld [vmem:[%s3689_s27] ss:$0 sm:$0xff] (!%p2321_p9) }
 0x970   : > { %v2688_v39 = vpop.eup %2687 }
 0x971   : > { %v1827_v40 = vmul.f32 %v2688_v39, %v1811_v24 }
 0x973   : > { %v1835_v61 = vmul.f32 %v2309_v54, %v1827_v40 }
 0x974   : > { %v2690_v42 = vpop.eup %2689 }
 0x975   : > { %v1828_v36 = vmul.f32 %v2690_v42, %v1812_v3  ;;  %v1843_v45 = vadd.f32 %v2310_v43, %v1835_v61 }
 0x977   : > { %v1836_v44 = vmul.f32 %v2309_v54, %v1828_v36 }
 0x979   : > { %v1844_v46 = vadd.f32 %v2310_v43, %v1836_v44 }
 0x97b   : > { %v1845_v47 = vpack.c.bf16 %v1844_v46, %v1843_v45 }
 0x97d   : > { %2495 = vmatmul.mubr.msk.bf16.vlgmr.msra.gmra.mrb[36].mxu0 %vm701_vm1, %v1845_v47 }
 0xa50   : > { %v1906_v57 = vpop.f32.mrb[36].mxu0 }
 0xa51   : > { %v1907_v58 = vadd.f32 %v2311_v56, %v1906_v57  ;;  %v2496_v59 = vpop.f32.mrb[37].mxu0 }
 0xa52   : > { %v1909_v62 = vpop.f32.mrb[38].mxu0 }
 0xa53   : > { %v1915_v63 = vmul.f32 0.70710677, %v1907_v58  ;;  %v1910_v0 = vadd.f32 %v2311_v56, %v1909_v62  ;;  %v2497_v1 = vpop.f32.mrb[39].mxu0  ;;  %v1913_v7 = vmul.f32 0.5, %v1907_v58 }
 0xa55   : > { %2691 = verf.f32 %v1915_v63  ;;  %v1916_v4 = vmul.f32 0.70710677, %v1910_v0  ;;  %v1914_v17 = vmul.f32 0.5, %v1910_v0 }
 0xa57   : > { %2693 = verf.f32 %v1916_v4 }
 0xa5f   : > { %v2692_v60 = vpop.eup %2691 }
 0xa60   : > { %v1919_v5 = vadd.f32 1.0, %v2692_v60 }
 0xa61   : > { %v2694_v6 = vpop.eup %2693 }
 0xa62   : > { %v1920_v8 = vadd.f32 1.0, %v2694_v6  ;;  %v1921_v49 = vmul.f32 %v1919_v5, %v1913_v7 }
 0xa64   : > { %v1922_v41 = vmul.f32 %v1920_v8, %v1914_v17 }
 0xa66   : > { %v1923_v50 = vpack.c.bf16 %v1922_v41, %v1921_v49 }
 0xa68   : > { %2507 = vmatmul.mubr.msk.bf16.vlgmr.msra.gmra.mrb[36].mxu1 %vm1963_vm7, %v1923_v50 }
 0xb3b   : > { %v2001_v10 = vpop.f32.mrb[36].mxu1 }
 0xb3c   : > { %v2002_v11 = vadd.f32 %v2315_v9, %v2001_v10  ;;  %v2508_v12 = vpop.f32.mrb[37].mxu1  ;;  %2015 = sbr.rel (%p2321_p9) target bundleno = 3198 (0xc7e), region = 100 }
 0xb3d   : > { %v2004_v13 = vpop.f32.mrb[38].mxu1 }
 0xb3e   : > { %v2008_v14 = vadd.f32 %v2002_v11, %v3531_v15  ;;  %v2005_v16 = vadd.f32 %v2315_v9, %v2004_v13  ;;  %v2509_v18 = vpop.f32.mrb[39].mxu1 }
 0xb40   : > { %2010 = vst.msk [vmem:[#allocation2] sm:$0xff] %vm701_vm1, %v2008_v14  ;;  %v2009_v20 = vadd.f32 %v2005_v16, %v3534_v19  ;;  %v2018_v55 = vsel (!%p2321_p9), %vm701_vm1, %v2008_v14, 0.0 }
 0xb41   : > { %2019 = vadd.xlane.f32.xlu0 (!%p2321_p9), %v2018_v55 }
 0xb42   : > { %2011 = vst.msk [vmem:[#allocation2 + $0x8] sm:$0xff] %vm701_vm1, %v2009_v20  ;;  %v2021_v21 = vsel (!%p2321_p9), %vm701_vm1, %v2009_v20, 0.0 }
 0xb45   : > { %2022 = vadd.xlane.f32.xlu0 %v2021_v21 }
 0xbce   : > { %v2020_v22 = vpop.xlane.xlu0 %2019 }
 0xbcf   : > { %v2024_v23 = vmul.f32 0.03125, %v2020_v22 }
 0xbd1   : > { %v2026_v15 = vsub.f32 %v2008_v14, %v2024_v23 }
 0xbd2   : > { %v2023_v2 = vpop.xlane.xlu0 %2022 }
 0xbd3   : > { %v2025_v24 = vmul.f32 0.03125, %v2023_v2  ;;  %v2028_v25 = vmul.f32 %v2026_v15, %v2026_v15 }
 0xbd5   : > { %v2027_v3 = vsub.f32 %v2009_v20, %v2025_v24  ;;  %v2030_v19 = vsel %vm701_vm1, %v2028_v25, 0.0 }
 0xbd6   : > { %2031 = vadd.xlane.f32.xlu1 %v2030_v19 }
 0xbd7   : > { %v2029_v26 = vmul.f32 %v2027_v3, %v2027_v3 }
 0xbd9   : > { %v2033_v27 = vsel %vm701_vm1, %v2029_v26, 0.0 }
 0xbda   : > { %2034 = vadd.xlane.f32.xlu1 %v2033_v27 }
 0xc63   : > { %v2032_v28 = vpop.xlane.xlu1 %2031 }
 0xc64   : > { %v2036_v29 = vmul.f32 0.03125, %v2032_v28 }
 0xc66   : > { %v2038_v30 = vadd.f32 1e-05, %v2036_v29 }
 0xc67   : > { %v2035_v31 = vpop.xlane.xlu1 %2034 }
 0xc68   : > { %2695 = vrsqrt.f32 %v2038_v30  ;;  %v2037_v32 = vmul.f32 0.03125, %v2035_v31 }
 0xc6a   : > { %v2039_v33 = vadd.f32 1e-05, %v2037_v32 }
 0xc6c   : > { %2697 = vrsqrt.f32 %v2039_v33 }
 0xc72   : > { %v2696_v34 = vpop.eup %2695 }
 0xc73   : > { %v2042_v37 = vmul.f32 %v2696_v34, %v2026_v15 }
 0xc75   : > { %v2050_v39 = vmul.f32 %v2322_v35, %v2042_v37 }
 0xc76   : > { %v2698_v40 = vpop.eup %2697 }
 0xc77   : > { %v2058_v54 = vadd.f32 %v2323_v38, %v2050_v39  ;;  %v2043_v42 = vmul.f32 %v2698_v40, %v2027_v3 }
 0xc79   : > { %2060 = vst.msk [vmem:[#allocation12] sm:$0xff] %vm701_vm1, %v2058_v54  ;;  %v2051_v61 = vmul.f32 %v2322_v35, %v2043_v42 }
 0xc7b   : > { %v2059_v36 = vadd.f32 %v2323_v38, %v2051_v61 }
 0xc7d   : > { %2061 = vst.msk [vmem:[#allocation12 + $0x8] sm:$0xff] %vm701_vm1, %v2059_v36 }
 0xc7e PF: > { %p2546_p12 = scmp.eq.s32.totalorder %s3151_s2, 1  ;;  %s2954_s15 = smov [#allocation12]  }
 0xc7f   : > { %s2071_s9 = sshll.u32 %s2954_s15, 4  ;;  %s2072_s9 = int_to_ptr.vmem [resolvable:$true] %s2071_s9 }
 0xc80   : > { %s2847_s23 = scalar_lea.vmem %s2072_s9, 256  ;;  %p2854_p6 = scmp.lt.s32.totalorder %s2072_s9, %s2072_s9 }
 0xc81   : > { %p2848_p13 = scmp.ne.s32.totalorder %s2072_s9, %s2847_s23  ;;  %p2855_p0 = scmp.lt.s32.totalorder %s2847_s23, %s2847_s23 }
 0xc83   : > { %p2849_p8 = pnand %p2848_p13, %p2546_p12  ;;  %p2856_p1 = por %p2855_p0, %p2854_p6 }
 0xc85   : > { %p2850_p2 = pneg %p2849_p8 }
 0xc87   : > { %p2857_p7 = pnand %p2856_p1, %p2850_p2 }
 0xc89   : > { %2860 = shalt.err (!%p2857_p7)
}
 0xc8a   : > { %s3690_s14 = sld [smem:[#allocation29_spill]] }
 0xc90   : > { %s2861_s29 = scalar_lea.hbm %s3690_s14, 256 }
 0xc91   : > { %p2862_p10 = scmp.ne.s32.totalorder %s3690_s14, %s2861_s29  ;;  %p2867_p3 = scmp.lt.u32.totalorder %s2861_s29, %s3690_s14 }
 0xc93   : > { %p2863_p11 = pnand %p2862_p10, %p2546_p12 }
 0xc95   : > { %p2864_p5 = pneg %p2863_p11 }
 0xc97   : > { %p2869_p4 = pnand %p2867_p3, %p2864_p5 }
 0xc99   : > { %2872 = shalt.err (!%p2869_p4)
}
 0xc9a   : > { %s2955_s24 = smov 128  }
 0xc9b   : > { %2523 = dma.vmem_to_hbm [thread:$0]  (%p2546_p12), %s2072_s9, 256, %s3690_s14, [#allocation5], %s2955_s24, %s2955_s24, %s2951_s22  }
 0xc9c   : > { %2910 = dma.done.wait (%p2546_p12), [#allocation5], 256  }
 0xc9d   : > { %2912 = vsyncadd (%p2546_p12), [#allocation5], 4294967040 }
 0xc9e PF: > { %s3691_s7 = sld [smem:[#allocation19_spill]]  ;;  %s3692_s12 = sld [smem:[#allocation17_spill]] }
 0xc9f   : > { %s3693_s27 = sld [smem:[#allocation21_spill]]  ;;  %s3694_s28 = sld [smem:[#allocation18_spill]] }
 0xca0   : > { %s3695_s29 = sld [smem:[#allocation20_spill]]  ;;  %s3696_s25 = smov %s2919_s26 }
 0xca4   : > { %s31_s30 = sadd.s32 1, %s3691_s7   ;;  %s3697_s26 = smov %s3692_s12 }
 0xca5   : > { %p28_p9 = scmp.ge.s32.totalorder %s31_s30, 4  }
 0xca7   :  { %30 = sbr.rel (!%p28_p9) target bundleno = 17 (0x11), region = 177 }
 0xcae   :  { %2087 = vsyncpa [#allocation4], 1 }
 0xcaf   :  { %2089 = vsyncpa [#allocation4 + $0x1], 1 }
 0xcb0   :  { %2090 = vsyncpa [#allocation7], 1 }
 0xcb1   :  { %2092 = vsyncpa [#allocation7 + $0x1], 1 }
 0xcb2   :  { %2093 = vsyncpa [#allocation10], 1 }
 0xcb3   :  { %2095 = vsyncpa [#allocation10 + $0x1], 1 }
 0xcb4   :  { %2096 = vsyncpa [#allocation5], 1 }
 0xcb5   :  { %2098 = vsyncpa [#allocation5 + $0x1], 1 }

</bundles_post_ra>
